<compile_context>
chip_gen: v7x
topology: tpu7x:2x2x1
jax: 0.10.0
libtpu: 0.0.40
codegen_flags: <defaults>
</compile_context>

<pallas_src>
import jax
import jax.numpy as jnp
from jax.experimental import pallas as pl
from jax.experimental.pallas import tpu as pltpu

# ---------------- static NestedGrid structure ----------------
SIZES = (3, 5, 7)
GRID_SIZES = tuple(s * s for s in SIZES)                         # (9, 25, 49)
G_DIM = sum(GRID_SIZES)                                          # 83
OFFSETS = tuple(sum(GRID_SIZES[:i]) for i in range(len(SIZES)))  # (0, 9, 34)
N_LEVELS = len(SIZES)

# Use sensory_dim == hippocampal_dim so the S=None random-weight branch of the
# reference (`W_hs = randn(s_dim, h_dim)`) is shape-consistent with the forward.
SENSORY_DIM = 64
HIPPO_DIM = 64
HG_SPARSITY = 0.6
THETA = 0.5

# ---------------- kernel layout constants ----------------
G_PAD = 128   # one lane-dense output tile: [0,83) one-hot, [83,86) packed idx


def _pick_tm(batch):
    """Largest batch tile in {128, 256, 512, 1024} such that at least two grid
    steps remain when the batch allows it (keeps both v7x TensorCores fed via
    dimension_semantics=("parallel",)).  VMEM per step at TM=1024 is < 1 MiB."""
    cap = min(1024, max(128, batch // 2))
    tm = 128
    while tm * 2 <= cap:
        tm *= 2
    return tm


# ---------------- Pallas kernel (the hot path) ----------------
def vectorhash_kernel(s_ref, whst_ref, wght_ref, out_ref):
    # s_ref:    (TM, S)       bf16
    # whst_ref: (S, H)        bf16   (W_hs^T, VMEM-resident across grid steps)
    # wght_ref: (H, G_PAD)    bf16   (W_gh^T, zero-padded cols, VMEM-resident)
    # out_ref:  (TM, G_PAD)   bf16   lanes [0,G_DIM): one-hot,
    #                                lanes [G_DIM, G_DIM+N_LEVELS): indices.
    s = s_ref[...]

    # h = relu(sense @ W_hs^T)  -> (TM, H), f32 accumulation on the MXU.
    h = jnp.dot(s, whst_ref[...], preferred_element_type=jnp.float32)
    h = jnp.maximum(h, 0.0)

    # g = h @ W_gh^T  -> (TM, G_PAD), bf16 inputs, f32 accumulation.
    g = jnp.dot(h.astype(jnp.bfloat16), wght_ref[...],
                preferred_element_type=jnp.float32)

    # Segmented argmax + one-hot with full-lane masked reductions (no
    # sub-lane slicing, no partial stores).  Padded lanes (>= G_DIM) are never
    # inside any segment mask, so they cannot win the argmax.  Exact first-max
    # tie-break (max, then min matching column) to match torch.argmax.
    col = jax.lax.broadcasted_iota(jnp.int32, g.shape, 1)
    out = jnp.zeros(g.shape, jnp.float32)
    for level, (off, sz) in enumerate(zip(OFFSETS, GRID_SIZES)):
        in_seg = (col >= off) & (col < off + sz)
        seg = jnp.where(in_seg, g, -jnp.inf)
        m = jnp.max(seg, axis=-1, keepdims=True)                 # (TM, 1)
        cand = jnp.where(seg == m, col, G_PAD)                   # first-max tie break
        amax = jnp.min(cand, axis=-1, keepdims=True)             # (TM, 1) global col idx
        # One-hot lane.
        out = out + jnp.where(col == amax, 1.0, 0.0)
        # Packed index payload lane (values 0..48, exactly representable in bf16).
        out = out + jnp.where(col == G_DIM + level,
                              (amax - off).astype(jnp.float32), 0.0)

    # Single lane-dense bf16 store (exact: values are 0/1 or small integers).
    out_ref[...] = out.astype(jnp.bfloat16)


@jax.jit
def vectorhash_forward(sense, W_hsT, W_ghT):
    """sense: (S,) or (B, S) f32/bf16; W_hsT: (S, H) bf16; W_ghT: (H, G_PAD) bf16."""
    single = sense.ndim == 1
    s2d = sense.reshape(1, SENSORY_DIM) if single else sense
    B = s2d.shape[0]
    s2d = s2d.astype(jnp.bfloat16)

    tm = _pick_tm(B)
    grid = pl.cdiv(B, tm)

    flops = 2 * B * SENSORY_DIM * HIPPO_DIM + 2 * B * HIPPO_DIM * G_PAD
    bytes_accessed = (B * SENSORY_DIM * 2          # sense read
                      + SENSORY_DIM * HIPPO_DIM * 2  # W_hs^T read
                      + HIPPO_DIM * G_PAD * 2        # W_gh^T read
                      + B * G_PAD * 2)               # packed output write

    out = pl.pallas_call(
        vectorhash_kernel,
        out_shape=jax.ShapeDtypeStruct((B, G_PAD), jnp.bfloat16),
        grid=(grid,),
        in_specs=[
            pl.BlockSpec((tm, SENSORY_DIM), lambda t: (t, 0)),
            # Constant block index -> weights stay VMEM-resident across steps.
            pl.BlockSpec((SENSORY_DIM, HIPPO_DIM), lambda t: (0, 0)),
            pl.BlockSpec((HIPPO_DIM, G_PAD), lambda t: (0, 0)),
        ],
        out_specs=pl.BlockSpec((tm, G_PAD), lambda t: (t, 0)),
        compiler_params=pltpu.CompilerParams(
            dimension_semantics=("parallel",)),
        cost_estimate=pl.CostEstimate(flops=flops, transcendentals=0,
                                      bytes_accessed=bytes_accessed),
    )(s2d, W_hsT.astype(jnp.bfloat16), W_ghT.astype(jnp.bfloat16))

    # Split the packed tile: one-hot lanes and index lanes.  Lanes >= G_DIM of
    # the exposed one-hot are never returned, so packed indices cannot leak.
    onehot = out[:, :G_DIM].astype(jnp.float32)
    # PyTorch returns int64 indices; int32 is emitted here (JAX default width).
    idx = out[:, G_DIM:G_DIM + N_LEVELS].astype(jnp.int32)
    if single:
        return onehot[0], idx[0]
    return onehot, idx


# ---------------- deterministic weight init (plain-JAX glue) ----------------
def init_weights(key):
    k_hg, k_mask, k_hs = jax.random.split(key, 3)
    # W_hg: sparse random hippocampus <- grid weights (used to build W_gh).
    W_hg = jax.random.normal(k_hg, (HIPPO_DIM, G_DIM), jnp.float32)
    W_hg = W_hg * (jax.random.uniform(k_mask, (HIPPO_DIM, G_DIM)) <= HG_SPARSITY)

    # W_gh accumulated over all joint grid states, as in _initialize_weights:
    #   W_gh += g_onehot[:, None] @ relu(W_hg @ g_onehot - theta)[None, :] / h_dim
    ii = jnp.meshgrid(*[jnp.arange(gs) for gs in GRID_SIZES], indexing="ij")
    idx = jnp.stack([i.ravel() for i in ii], axis=1)                   # (P, n_levels)
    onehots = jnp.concatenate(
        [jax.nn.one_hot(idx[:, l], GRID_SIZES[l], dtype=jnp.float32)
         for l in range(N_LEVELS)], axis=1)                            # (P, G)
    H = jax.nn.relu(onehots @ W_hg.T - THETA)                          # (P, H)
    W_gh = (onehots.T @ H) / HIPPO_DIM                                 # (G, H)

    # W_hs: random sensory -> hippocampus projection (S=None branch).
    W_hs = jax.random.normal(k_hs, (HIPPO_DIM, SENSORY_DIM), jnp.float32)

    # Kernel-friendly forms: pre-transposed, lane-padded, bf16.
    W_hsT = W_hs.T.astype(jnp.bfloat16)                                # (S, H)
    W_ghT = jnp.zeros((HIPPO_DIM, G_PAD), jnp.float32)
    W_ghT = W_ghT.at[:, :G_DIM].set(W_gh.T).astype(jnp.bfloat16)       # (H, G_PAD)
    return W_hsT, W_ghT


# ---------------- pure-JAX reference for verification ----------------
def reference_forward(sense, W_hsT, W_ghT):
    s = jnp.atleast_2d(sense).astype(jnp.bfloat16)
    h = jax.nn.relu(jnp.dot(s, W_hsT.astype(jnp.bfloat16),
                            preferred_element_type=jnp.float32))
    g = jnp.dot(h.astype(jnp.bfloat16), W_ghT.astype(jnp.bfloat16),
                preferred_element_type=jnp.float32)[:, :G_DIM]
    onehots, idxs = [], []
    for off, sz in zip(OFFSETS, GRID_SIZES):
        seg = g[:, off:off + sz]
        i = jnp.argmax(seg, axis=-1)
        idxs.append(i)
        onehots.append(jax.nn.one_hot(i, sz, dtype=jnp.float32))
    return jnp.concatenate(onehots, axis=1), jnp.stack(idxs, axis=1).astype(jnp.int32)


if __name__ == "__main__":
    key = jax.random.PRNGKey(0)
    k_w, k_s, k_s2 = jax.random.split(key, 3)
    W_hsT, W_ghT = init_weights(k_w)

    # Batched path (tile-aligned: 2 grid steps).
    B = 256
    sense = jax.random.normal(k_s, (B, SENSORY_DIM), jnp.float32)
    onehot, indices = vectorhash_forward(sense, W_hsT, W_ghT)
    jax.block_until_ready((onehot, indices))

    onehot_ref, indices_ref = reference_forward(sense, W_hsT, W_ghT)
    assert onehot.shape == (B, G_DIM) and indices.shape == (B, N_LEVELS)
    assert jnp.array_equal(indices, indices_ref), (indices, indices_ref)
    assert jnp.array_equal(onehot, onehot_ref), (onehot, onehot_ref)

    # Ragged batch (last tile handled by masked edge writes, no host pad).
    B2 = 200
    sense2 = jax.random.normal(k_s2, (B2, SENSORY_DIM), jnp.float32)
    onehot2, indices2 = vectorhash_forward(sense2, W_hsT, W_ghT)
    jax.block_until_ready((onehot2, indices2))
    onehot2_ref, indices2_ref = reference_forward(sense2, W_hsT, W_ghT)
    assert onehot2.shape == (B2, G_DIM) and indices2.shape == (B2, N_LEVELS)
    assert jnp.array_equal(indices2, indices2_ref)
    assert jnp.array_equal(onehot2, onehot2_ref)

    # Single-vector path (matches the PyTorch module's forward signature).
    onehot1, idx1 = vectorhash_forward(sense[0], W_hsT, W_ghT)
    jax.block_until_ready((onehot1, idx1))
    assert onehot1.shape == (G_DIM,) and idx1.shape == (N_LEVELS,)
    assert jnp.array_equal(idx1, indices_ref[0])
    assert jnp.array_equal(onehot1, onehot_ref[0])

    # TODO(synk): NestedGrid.shift / recall_sense / weight-accumulation init are
    # host-side bookkeeping, kept as plain JAX rather than Pallas kernels.
    print("KERNEL_OK")
</pallas_src>

<mosaic_0001>
module attributes {stable_mosaic.version = 11 : i64} {
  func.func @vectorhash_kernel(%arg0: i32, %arg1: memref<128x64xbf16, #tpu.memory_space<vmem>>, %arg2: memref<64x64xbf16, #tpu.memory_space<vmem>>, %arg3: memref<64x128xbf16, #tpu.memory_space<vmem>>, %arg4: memref<128x128xbf16, #tpu.memory_space<vmem>>) attributes {dimension_semantics = [#tpu.dimension_semantics<parallel>], iteration_bounds = array<i64: 2>, scalar_prefetch = 0 : i64, scratch_operands = 0 : i64, tpu.core_type = #tpu.core_type<tc>, window_params = [{transform_indices = @transform_0, window_bounds = array<i64: 128, 64>}, {pipeline_mode = #tpu.pipeline_mode<synchronous>, transform_indices = @transform_1, window_bounds = array<i64: 64, 64>}, {pipeline_mode = #tpu.pipeline_mode<synchronous>, transform_indices = @transform_2, window_bounds = array<i64: 64, 128>}, {transform_indices = @transform_3, window_bounds = array<i64: 128, 128>}]} {
    %c0 = arith.constant 0 : index
    %c0_0 = arith.constant 0 : index
    %0 = vector.load %arg1[%c0, %c0_0] : memref<128x64xbf16, #tpu.memory_space<vmem>>, vector<128x64xbf16>
    %c0_1 = arith.constant 0 : index
    %c0_2 = arith.constant 0 : index
    %1 = vector.load %arg2[%c0_1, %c0_2] : memref<64x64xbf16, #tpu.memory_space<vmem>>, vector<64x64xbf16>
    %cst = arith.constant dense<0.000000e+00> : vector<128x64xf32>
    %2 = tpu.matmul %0, %1, %cst {dimension_numbers = #tpu.dot_dimension_numbers<[1], [0], [0], [1], [0, 0, 1, 1], [], []>} : vector<128x64xbf16>, vector<64x64xbf16>, vector<128x64xf32> -> vector<128x64xf32>
    %cst_3 = arith.constant 0.000000e+00 : f32
    %3 = vector.broadcast %cst_3 : f32 to vector<128x64xf32>
    %4 = arith.maximumf %2, %3 : vector<128x64xf32>
    %5 = arith.truncf %4 : vector<128x64xf32> to vector<128x64xbf16>
    %c0_4 = arith.constant 0 : index
    %c0_5 = arith.constant 0 : index
    %6 = vector.load %arg3[%c0_4, %c0_5] : memref<64x128xbf16, #tpu.memory_space<vmem>>, vector<64x128xbf16>
    %cst_6 = arith.constant dense<0.000000e+00> : vector<128x128xf32>
    %7 = tpu.matmul %5, %6, %cst_6 {dimension_numbers = #tpu.dot_dimension_numbers<[1], [0], [0], [1], [0, 0, 1, 1], [], []>} : vector<128x64xbf16>, vector<64x128xbf16>, vector<128x128xf32> -> vector<128x128xf32>
    %8 = tpu.iota {dimensions = array<i32: 1>} : vector<128x128xi32>
    %cst_7 = arith.constant 0.000000e+00 : f32
    %9 = vector.broadcast %cst_7 : f32 to vector<128x128xf32>
    %c0_i32 = arith.constant 0 : i32
    %10 = vector.broadcast %c0_i32 : i32 to vector<128x128xi32>
    %11 = arith.cmpi sge, %8, %10 : vector<128x128xi32>
    %c9_i32 = arith.constant 9 : i32
    %12 = vector.broadcast %c9_i32 : i32 to vector<128x128xi32>
    %13 = arith.cmpi slt, %8, %12 : vector<128x128xi32>
    %14 = arith.andi %11, %13 : vector<128x128xi1>
    %cst_8 = arith.constant 0xFF800000 : f32
    %15 = vector.broadcast %cst_8 : f32 to vector<128x128xf32>
    %16 = arith.select %14, %7, %15 : vector<128x128xi1>, vector<128x128xf32>
    %cst_9 = arith.constant dense<0xFF800000> : vector<128xf32>
    %17 = vector.multi_reduction <maximumf>, %16, %cst_9 [1] : vector<128x128xf32> to vector<128xf32>
    %18 = vector.shape_cast %17 : vector<128xf32> to vector<128x1xf32>
    %19 = vector.broadcast %18 : vector<128x1xf32> to vector<128x128xf32>
    %20 = arith.cmpf oeq, %16, %19 : vector<128x128xf32>
    %c128_i32 = arith.constant 128 : i32
    %21 = vector.broadcast %c128_i32 : i32 to vector<128x128xi32>
    %22 = arith.select %20, %8, %21 : vector<128x128xi1>, vector<128x128xi32>
    %cst_10 = arith.constant dense<2147483647> : vector<128xi32>
    %23 = vector.multi_reduction <minsi>, %22, %cst_10 [1] : vector<128x128xi32> to vector<128xi32>
    %24 = vector.shape_cast %23 : vector<128xi32> to vector<128x1xi32>
    %25 = vector.broadcast %24 : vector<128x1xi32> to vector<128x128xi32>
    %26 = arith.cmpi eq, %8, %25 : vector<128x128xi32>
    %cst_11 = arith.constant 1.000000e+00 : f32
    %cst_12 = arith.constant 0.000000e+00 : f32
    %27 = vector.broadcast %cst_11 : f32 to vector<128x128xf32>
    %28 = vector.broadcast %cst_12 : f32 to vector<128x128xf32>
    %29 = arith.select %26, %27, %28 : vector<128x128xi1>, vector<128x128xf32>
    %30 = arith.addf %9, %29 : vector<128x128xf32>
    %c83_i32 = arith.constant 83 : i32
    %31 = vector.broadcast %c83_i32 : i32 to vector<128x128xi32>
    %32 = arith.cmpi eq, %8, %31 : vector<128x128xi32>
    %c0_i32_13 = arith.constant 0 : i32
    %33 = vector.broadcast %c0_i32_13 : i32 to vector<128x1xi32>
    %34 = arith.subi %24, %33 : vector<128x1xi32>
    %35 = arith.sitofp %34 : vector<128x1xi32> to vector<128x1xf32>
    %cst_14 = arith.constant 0.000000e+00 : f32
    %36 = vector.shape_cast %35 : vector<128x1xf32> to vector<128x1xf32>
    %37 = vector.broadcast %36 : vector<128x1xf32> to vector<128x128xf32>
    %38 = vector.broadcast %cst_14 : f32 to vector<128x128xf32>
    %39 = arith.select %32, %37, %38 : vector<128x128xi1>, vector<128x128xf32>
    %40 = arith.addf %30, %39 : vector<128x128xf32>
    %c9_i32_15 = arith.constant 9 : i32
    %41 = vector.broadcast %c9_i32_15 : i32 to vector<128x128xi32>
    %42 = arith.cmpi sge, %8, %41 : vector<128x128xi32>
    %c34_i32 = arith.constant 34 : i32
    %43 = vector.broadcast %c34_i32 : i32 to vector<128x128xi32>
    %44 = arith.cmpi slt, %8, %43 : vector<128x128xi32>
    %45 = arith.andi %42, %44 : vector<128x128xi1>
    %cst_16 = arith.constant 0xFF800000 : f32
    %46 = vector.broadcast %cst_16 : f32 to vector<128x128xf32>
    %47 = arith.select %45, %7, %46 : vector<128x128xi1>, vector<128x128xf32>
    %cst_17 = arith.constant dense<0xFF800000> : vector<128xf32>
    %48 = vector.multi_reduction <maximumf>, %47, %cst_17 [1] : vector<128x128xf32> to vector<128xf32>
    %49 = vector.shape_cast %48 : vector<128xf32> to vector<128x1xf32>
    %50 = vector.broadcast %49 : vector<128x1xf32> to vector<128x128xf32>
    %51 = arith.cmpf oeq, %47, %50 : vector<128x128xf32>
    %c128_i32_18 = arith.constant 128 : i32
    %52 = vector.broadcast %c128_i32_18 : i32 to vector<128x128xi32>
    %53 = arith.select %51, %8, %52 : vector<128x128xi1>, vector<128x128xi32>
    %cst_19 = arith.constant dense<2147483647> : vector<128xi32>
    %54 = vector.multi_reduction <minsi>, %53, %cst_19 [1] : vector<128x128xi32> to vector<128xi32>
    %55 = vector.shape_cast %54 : vector<128xi32> to vector<128x1xi32>
    %56 = vector.broadcast %55 : vector<128x1xi32> to vector<128x128xi32>
    %57 = arith.cmpi eq, %8, %56 : vector<128x128xi32>
    %cst_20 = arith.constant 1.000000e+00 : f32
    %cst_21 = arith.constant 0.000000e+00 : f32
    %58 = vector.broadcast %cst_20 : f32 to vector<128x128xf32>
    %59 = vector.broadcast %cst_21 : f32 to vector<128x128xf32>
    %60 = arith.select %57, %58, %59 : vector<128x128xi1>, vector<128x128xf32>
    %61 = arith.addf %40, %60 : vector<128x128xf32>
    %c84_i32 = arith.constant 84 : i32
    %62 = vector.broadcast %c84_i32 : i32 to vector<128x128xi32>
    %63 = arith.cmpi eq, %8, %62 : vector<128x128xi32>
    %c9_i32_22 = arith.constant 9 : i32
    %64 = vector.broadcast %c9_i32_22 : i32 to vector<128x1xi32>
    %65 = arith.subi %55, %64 : vector<128x1xi32>
    %66 = arith.sitofp %65 : vector<128x1xi32> to vector<128x1xf32>
    %cst_23 = arith.constant 0.000000e+00 : f32
    %67 = vector.shape_cast %66 : vector<128x1xf32> to vector<128x1xf32>
    %68 = vector.broadcast %67 : vector<128x1xf32> to vector<128x128xf32>
    %69 = vector.broadcast %cst_23 : f32 to vector<128x128xf32>
    %70 = arith.select %63, %68, %69 : vector<128x128xi1>, vector<128x128xf32>
    %71 = arith.addf %61, %70 : vector<128x128xf32>
    %c34_i32_24 = arith.constant 34 : i32
    %72 = vector.broadcast %c34_i32_24 : i32 to vector<128x128xi32>
    %73 = arith.cmpi sge, %8, %72 : vector<128x128xi32>
    %c83_i32_25 = arith.constant 83 : i32
    %74 = vector.broadcast %c83_i32_25 : i32 to vector<128x128xi32>
    %75 = arith.cmpi slt, %8, %74 : vector<128x128xi32>
    %76 = arith.andi %73, %75 : vector<128x128xi1>
    %cst_26 = arith.constant 0xFF800000 : f32
    %77 = vector.broadcast %cst_26 : f32 to vector<128x128xf32>
    %78 = arith.select %76, %7, %77 : vector<128x128xi1>, vector<128x128xf32>
    %cst_27 = arith.constant dense<0xFF800000> : vector<128xf32>
    %79 = vector.multi_reduction <maximumf>, %78, %cst_27 [1] : vector<128x128xf32> to vector<128xf32>
    %80 = vector.shape_cast %79 : vector<128xf32> to vector<128x1xf32>
    %81 = vector.broadcast %80 : vector<128x1xf32> to vector<128x128xf32>
    %82 = arith.cmpf oeq, %78, %81 : vector<128x128xf32>
    %c128_i32_28 = arith.constant 128 : i32
    %83 = vector.broadcast %c128_i32_28 : i32 to vector<128x128xi32>
    %84 = arith.select %82, %8, %83 : vector<128x128xi1>, vector<128x128xi32>
    %cst_29 = arith.constant dense<2147483647> : vector<128xi32>
    %85 = vector.multi_reduction <minsi>, %84, %cst_29 [1] : vector<128x128xi32> to vector<128xi32>
    %86 = vector.shape_cast %85 : vector<128xi32> to vector<128x1xi32>
    %87 = vector.broadcast %86 : vector<128x1xi32> to vector<128x128xi32>
    %88 = arith.cmpi eq, %8, %87 : vector<128x128xi32>
    %cst_30 = arith.constant 1.000000e+00 : f32
    %cst_31 = arith.constant 0.000000e+00 : f32
    %89 = vector.broadcast %cst_30 : f32 to vector<128x128xf32>
    %90 = vector.broadcast %cst_31 : f32 to vector<128x128xf32>
    %91 = arith.select %88, %89, %90 : vector<128x128xi1>, vector<128x128xf32>
    %92 = arith.addf %71, %91 : vector<128x128xf32>
    %c85_i32 = arith.constant 85 : i32
    %93 = vector.broadcast %c85_i32 : i32 to vector<128x128xi32>
    %94 = arith.cmpi eq, %8, %93 : vector<128x128xi32>
    %c34_i32_32 = arith.constant 34 : i32
    %95 = vector.broadcast %c34_i32_32 : i32 to vector<128x1xi32>
    %96 = arith.subi %86, %95 : vector<128x1xi32>
    %97 = arith.sitofp %96 : vector<128x1xi32> to vector<128x1xf32>
    %cst_33 = arith.constant 0.000000e+00 : f32
    %98 = vector.shape_cast %97 : vector<128x1xf32> to vector<128x1xf32>
    %99 = vector.broadcast %98 : vector<128x1xf32> to vector<128x128xf32>
    %100 = vector.broadcast %cst_33 : f32 to vector<128x128xf32>
    %101 = arith.select %94, %99, %100 : vector<128x128xi1>, vector<128x128xf32>
    %102 = arith.addf %92, %101 : vector<128x128xf32>
    %103 = arith.truncf %102 : vector<128x128xf32> to vector<128x128xbf16>
    %c0_34 = arith.constant 0 : index
    %c0_35 = arith.constant 0 : index
    %104 = vector.load %arg4[%c0_34, %c0_35] : memref<128x128xbf16, #tpu.memory_space<vmem>>, vector<128x128xbf16>
    tpu.vector_store %arg4[%c0_34, %c0_35], %103 {strides = array<i32>} : memref<128x128xbf16, #tpu.memory_space<vmem>>, vector<128x128xbf16>,
    return
  }
  func.func @transform_0(%arg0: i32) -> (i32, i32) {
    %c0_i32 = arith.constant 0 : i32
    %c0_i32_0 = arith.constant 0 : i32
    return %arg0, %c0_i32 : i32, i32
  }
  func.func @transform_1(%arg0: i32) -> (i32, i32) {
    %c0_i32 = arith.constant 0 : i32
    %c0_i32_0 = arith.constant 0 : i32
    %c0_i32_1 = arith.constant 0 : i32
    return %c0_i32, %c0_i32_0 : i32, i32
  }
  func.func @transform_2(%arg0: i32) -> (i32, i32) {
    %c0_i32 = arith.constant 0 : i32
    %c0_i32_0 = arith.constant 0 : i32
    %c0_i32_1 = arith.constant 0 : i32
    return %c0_i32, %c0_i32_0 : i32, i32
  }
  func.func @transform_3(%arg0: i32) -> (i32, i32) {
    %c0_i32 = arith.constant 0 : i32
    %c0_i32_0 = arith.constant 0 : i32
    return %arg0, %c0_i32 : i32, i32
  }
}

</mosaic_0001>

<bundles_post_ra>
// kernel: vectorhash_forward.1
= control target key start
LH: loop header
LB: loop body
LE: loop exit
PB: predicated region body
PF: predicated region fallthrough
CT: control target
= control target key end

     0   :  { %s2224_s12 = smov 0   ;;  %s3573_s0 = inlined_call_operand.vmem [shape: bf16[256,64], index: 0, kind: input, shape index: {}]   ;;  %s3574_s1 = inlined_call_operand.vmem [shape: bf16[64,64], index: 1, kind: input, shape index: {}]   ;;  %s3575_s2 = inlined_call_operand.vmem [shape: bf16[64,128], index: 2, kind: input, shape index: {}]   ;;  %s3576_s3 = inlined_call_operand.vmem [shape: bf16[256,128], index: 3, kind: output, shape index: {}]  }
   0x1 LB: > { %s1944_s13 = sadd.s32 4294967295, %s2201_s12   ;;  %p1948_p0 = scmp.ge.s32.totalorder %s2201_s12, 1  ;;  %s2201_s12 = sphi %s2224_s12, %s13_s12  }
   0x2   : > { %p138_p1 = scmp.lt.s32.totalorder %s2201_s12, 3 }
   0x4   : > { %p139_p2 = pnand %p1948_p0, %p138_p1 }
   0x6   : > { %142 = sbr.rel (%p139_p2) target bundleno = 1027 (0x403), region = 32 }
   0xd   : > { %v2179_v0 = vld [vmem:[%s3574_s1] sm:$0xff]   ;;  %s1949_s16 = sshll.u32 %s1944_s13, 4  ;;  %v2180_v1 = vld [vmem:[%s3574_s1 + $0x8] sm:$0xff]   ;;  %v2181_v2 = vld [vmem:[%s3574_s1 + $0x10] sm:$0xff]   ;;  %vm263_vm0 = vcmask 523264   ;;  %v562_v56 = vlaneseq }
   0xe   : > { %p163_p3 = scmp.lt.s32.totalorder %s1949_s16, 31  ;;  %2122 = vmatprep.subr.bf16.mxu0 %v2179_v0  ;;  %v2191_v3 = vld [vmem:[%s3575_s2] sm:$0xff]   ;;  %v2192_v4 = vld [vmem:[%s3575_s2 + $0x8] sm:$0xff]   ;;  %v2182_v6 = vld [vmem:[%s3574_s1 + $0x18] sm:$0xff]  }
   0xf   : > { %2123 = vmatpush3.bf16.msra.mxu0 %v2179_v0  ;;  %2146 = vmatprep.subr.bf16.mxu1 %v2191_v3  ;;  %v2193_v14 = vld [vmem:[%s3575_s2 + $0x10] sm:$0xff]   ;;  %v2194_v15 = vld [vmem:[%s3575_s2 + $0x18] sm:$0xff]   ;;  %v2280_v57 = vand.u32 127, %v562_v56 }
  0x10   : > { %s3715_s16 = smov (!%p163_p3, %s1949_s16), 31  ;;  %2124 = vmatprep.subr.bf16.mxu0 %v2180_v1  ;;  %2147 = vmatpush3.bf16.msra.mxu1 %v2191_v3 }
  0x11   : > { %s1950_s23 = sshll.u32 %s3715_s16, 2  ;;  %2148 = vmatprep.subr.bf16.mxu1 %v2192_v4  ;;  %3622 = vst [vmem:[#allocation2_spill] sm:$0xff] %v2280_v57  ;;  %vm968_vm1 = vcmp.ge.s32.totalorder %v2280_v57, 9  ;;  %vm969_vm2 = vcmp.lt.s32.totalorder %v2280_v57, 34  ;;  %vm565_vm4 = vcmp.lt.s32.totalorder %v2280_v57, 9  ;;  %vm1388_vm5 = vcmp.ge.s32.totalorder %v2280_v57, 34 }
  0x12   : > { %s166_s28 = scalar_lea.vmem %s3573_s0, %s1950_s23  ;;  %vm2284_vm3 = vmand %vm968_vm1, %vm969_vm2  ;;  %vm1389_vm6 = vcmp.lt.s32.totalorder %v2280_v57, 83  ;;  %s3337_s10 = scalar_lea.vmem %s3576_s3, %s1950_s23 }
  0x13   : > { %2125 = vmatpush3.bf16.msra.mxu0 %v2180_v1  ;;  %v2183_v5 = vld [vmem:[%s166_s28] sm:$0xff]   ;;  %v2184_v7 = vld [vmem:[%s166_s28 + $0x8] sm:$0xff]   ;;  %v2185_v8 = vld [vmem:[%s166_s28 + $0x10] sm:$0xff]  }
  0x14   : > { %2126 = vmatprep.subr.bf16.mxu0 %v2181_v2  ;;  %2130 = vmatprep.mubr.msk.bf16.mxu0 %vm263_vm0, %v2183_v5  ;;  %v2186_v9 = vld [vmem:[%s166_s28 + $0x18] sm:$0xff]   ;;  %v2187_v10 = vld [vmem:[%s166_s28 + $0x20] sm:$0xff]   ;;  %v2188_v11 = vld [vmem:[%s166_s28 + $0x28] sm:$0xff]  }
  0x15   : > { %2149 = vmatpush3.bf16.msra.mxu1 %v2192_v4  ;;  %v2189_v12 = vld [vmem:[%s166_s28 + $0x30] sm:$0xff]   ;;  %v2190_v13 = vld [vmem:[%s166_s28 + $0x38] sm:$0xff]   ;;  %vm2301_vm7 = vmand %vm1388_vm5, %vm1389_vm6 }
  0x16   : > { %2150 = vmatprep.subr.bf16.mxu1 %v2193_v14 }
  0x17   : > { %2127 = vmatpush3.bf16.msra.mxu0 %v2181_v2 }
  0x18   : > { %2128 = vmatprep.subr.bf16.mxu0 %v2182_v6 }
  0x19   : > { %2151 = vmatpush3.bf16.msra.mxu1 %v2193_v14 }
  0x1a   : > { %2152 = vmatprep.subr.bf16.mxu1 %v2194_v15 }
  0x1b   : > { %2129 = vmatpush3.bf16.msra.mxu0 %v2182_v6 }
  0x1d   : > { %2153 = vmatpush3.bf16.msra.mxu1 %v2194_v15 }
  0x1e   : > { %2131 = vmatmul.mubr.msk.bf16.vlgmr.msra.gmra.mrb[0].mxu0 %vm263_vm0, %v2184_v7 }
  0x1f   : > { %2134 = vmatprep.mubr.msk.bf16.mxu0 %vm263_vm0, %v2185_v8 }
  0x26   : > { %2135 = vmatmul.mubr.msk.bf16.gmra.mrb[4].mxu0 %vm263_vm0, %v2186_v9 }
  0x27   : > { %2138 = vmatprep.mubr.msk.bf16.mxu0 %vm263_vm0, %v2187_v10 }
  0x2e   : > { %2139 = vmatmul.mubr.msk.bf16.gmra.mrb[8].mxu0 %vm263_vm0, %v2188_v11 }
  0x2f   : > { %2142 = vmatprep.mubr.msk.bf16.mxu0 %vm263_vm0, %v2189_v12 }
  0x36   : > { %2143 = vmatmul.mubr.msk.bf16.gmra.mrb[12].mxu0 %vm263_vm0, %v2190_v13 }
  0xf1   : > { %v2132_v16 = vpop.f32.mrb[0].mxu0 }
  0xf2   : > { %v322_v17 = vpop.f32.mrb[1].mxu0  ;;  %v387_v19 = vmax.f32 %v2132_v16, 0.0 }
  0xf3   : > { %v2133_v18 = vpop.f32.mrb[2].mxu0  ;;  %v385_v22 = vmax.f32 %v322_v17, 0.0 }
  0xf4   : > { %v388_v20 = vmax.f32 %v2133_v18, 0.0  ;;  %v325_v21 = vpop.f32.mrb[3].mxu0 }
  0xf5   : > { %v386_v23 = vmax.f32 %v325_v21, 0.0 }
  0xf6   : > { %v402_v24 = vpack.c.bf16 %v388_v20, %v387_v19 }
  0xf7   : > { %v401_v25 = vpack.c.bf16 %v386_v23, %v385_v22 }
  0xf9   : > { %2154 = vmatprep.mubr.msk.bf16.mxu1 %vm263_vm0, %v401_v25  ;;  %v2136_v26 = vpop.f32.mrb[4].mxu0 }
  0xfa   : > { %2155 = vmatmul.mubr.msk.bf16.vlgmr.msra.gmra.mrb[0].mxu1 %vm263_vm0, %v402_v24  ;;  %v391_v27 = vmax.f32 %v2136_v26, 0.0  ;;  %v338_v28 = vpop.f32.mrb[5].mxu0 }
  0xfb   : > { %v389_v29 = vmax.f32 %v338_v28, 0.0  ;;  %v2137_v30 = vpop.f32.mrb[6].mxu0 }
  0xfc   : > { %v392_v31 = vmax.f32 %v2137_v30, 0.0  ;;  %v341_v32 = vpop.f32.mrb[7].mxu0 }
  0xfd   : > { %v390_v33 = vmax.f32 %v341_v32, 0.0 }
  0xfe   : > { %v404_v34 = vpack.c.bf16 %v392_v31, %v391_v27 }
  0xff   : > { %v403_v35 = vpack.c.bf16 %v390_v33, %v389_v29 }
 0x101   : > { %2158 = vmatprep.mubr.msk.bf16.mxu1 %vm263_vm0, %v403_v35  ;;  %v2140_v36 = vpop.f32.mrb[8].mxu0 }
 0x102   : > { %2159 = vmatmul.mubr.msk.bf16.gmra.mrb[4].mxu1 %vm263_vm0, %v404_v34  ;;  %v395_v37 = vmax.f32 %v2140_v36, 0.0  ;;  %v354_v38 = vpop.f32.mrb[9].mxu0 }
 0x103   : > { %v393_v39 = vmax.f32 %v354_v38, 0.0  ;;  %v2141_v40 = vpop.f32.mrb[10].mxu0 }
 0x104   : > { %v396_v41 = vmax.f32 %v2141_v40, 0.0  ;;  %v357_v42 = vpop.f32.mrb[11].mxu0 }
 0x105   : > { %v394_v43 = vmax.f32 %v357_v42, 0.0 }
 0x106   : > { %v406_v44 = vpack.c.bf16 %v396_v41, %v395_v37 }
 0x107   : > { %v405_v45 = vpack.c.bf16 %v394_v43, %v393_v39 }
 0x109   : > { %2162 = vmatprep.mubr.msk.bf16.mxu1 %vm263_vm0, %v405_v45  ;;  %v2144_v46 = vpop.f32.mrb[12].mxu0 }
 0x10a   : > { %2163 = vmatmul.mubr.msk.bf16.gmra.mrb[8].mxu1 %vm263_vm0, %v406_v44  ;;  %v399_v47 = vmax.f32 %v2144_v46, 0.0  ;;  %v370_v48 = vpop.f32.mrb[13].mxu0 }
 0x10b   : > { %v397_v49 = vmax.f32 %v370_v48, 0.0  ;;  %v2145_v50 = vpop.f32.mrb[14].mxu0 }
 0x10c   : > { %v400_v51 = vmax.f32 %v2145_v50, 0.0  ;;  %v373_v52 = vpop.f32.mrb[15].mxu0 }
 0x10d   : > { %v398_v53 = vmax.f32 %v373_v52, 0.0 }
 0x10e   : > { %v408_v54 = vpack.c.bf16 %v400_v51, %v399_v47 }
 0x10f   : > { %v407_v55 = vpack.c.bf16 %v398_v53, %v397_v49 }
 0x111   : > { %2166 = vmatprep.mubr.msk.bf16.mxu1 %vm263_vm0, %v407_v55 }
 0x112   : > { %2167 = vmatmul.mubr.msk.bf16.gmra.mrb[12].mxu1 %vm263_vm0, %v408_v54 }
 0x1cd   : > { %v2156_v59 = vpop.f32.mrb[0].mxu1 }
 0x1ce   : > { %v499_v60 = vpop.f32.mrb[1].mxu1  ;;  %v2293_v61 = vsel %vm2284_vm3, %v2156_v59, -inf  ;;  %v2297_v62 = vsel %vm565_vm4, %v2156_v59, -inf  ;;  %v2307_v2 = vsel %vm2301_vm7, %v2156_v59, -inf }
 0x1cf   : > { %991 = vmax.xlane.f32.xlu0 %v2293_v61  ;;  %587 = vmax.xlane.f32.xlu1 %v2297_v62  ;;  %v2157_v63 = vpop.f32.mrb[2].mxu1  ;;  %v2317_v5 = vsel %vm565_vm4, %v499_v60, -inf  ;;  %v2327_v10 = vsel %vm2284_vm3, %v499_v60, -inf  ;;  %v2339_v13 = vsel %vm2301_vm7, %v499_v60, -inf }
 0x1d0   : > { %v502_v1 = vpop.f32.mrb[3].mxu1  ;;  %v2311_v3 = vsel %vm565_vm4, %v2157_v63, -inf  ;;  %v2321_v6 = vsel %vm2284_vm3, %v2157_v63, -inf  ;;  %v2331_v11 = vsel %vm2301_vm7, %v2157_v63, -inf }
 0x1d1   : > { %v2343_v14 = vsel %vm2284_vm3, %v502_v1, -inf  ;;  %v2369_v22 = vsel %vm2301_vm7, %v502_v1, -inf  ;;  %v2373_v23 = vsel %vm565_vm4, %v502_v1, -inf }
 0x1d3   : > { %1411 = vmax.xlane.f32.xlu0 %v2307_v2  ;;  %589 = vmax.xlane.f32.xlu1 %v2311_v3 }
 0x1d5   : > { %v2160_v4 = vpop.f32.mrb[4].mxu1 }
 0x1d6   : > { %v515_v7 = vpop.f32.mrb[5].mxu1  ;;  %v2379_v24 = vsel %vm565_vm4, %v2160_v4, -inf  ;;  %v2437_v42 = vsel %vm2284_vm3, %v2160_v4, -inf  ;;  %v2447_v44 = vsel %vm2301_vm7, %v2160_v4, -inf }
 0x1d7   : > { %583 = vmax.xlane.f32.xlu0 %v2317_v5  ;;  %993 = vmax.xlane.f32.xlu1 %v2321_v6  ;;  %v2161_v8 = vpop.f32.mrb[6].mxu1  ;;  %v2457_v46 = vsel %vm565_vm4, %v515_v7, -inf  ;;  %v2467_v48 = vsel %vm2284_vm3, %v515_v7, -inf  ;;  %v2477_v50 = vsel %vm2301_vm7, %v515_v7, -inf }
 0x1d8   : > { %v518_v9 = vpop.f32.mrb[7].mxu1  ;;  %v2383_v25 = vsel %vm565_vm4, %v2161_v8, -inf  ;;  %v2441_v43 = vsel %vm2284_vm3, %v2161_v8, -inf  ;;  %v2451_v45 = vsel %vm2301_vm7, %v2161_v8, -inf }
 0x1d9   : > { %v2461_v47 = vsel %vm565_vm4, %v518_v9, -inf  ;;  %v2471_v49 = vsel %vm2284_vm3, %v518_v9, -inf  ;;  %v2481_v51 = vsel %vm2301_vm7, %v518_v9, -inf }
 0x1db   : > { %987 = vmax.xlane.f32.xlu0 %v2327_v10  ;;  %1413 = vmax.xlane.f32.xlu1 %v2331_v11 }
 0x1dd   : > { %v2335_v12 = vpop.f32.mrb[8].mxu1 }
 0x1de   : > { %v2345_v15 = vpop.f32.mrb[9].mxu1  ;;  %v2488_v52 = vsel %vm565_vm4, %v2335_v12, -inf  ;;  %v2499_v54 = vsel %vm2284_vm3, %v2335_v12, -inf  ;;  %v2510_v56 = vsel %vm2301_vm7, %v2335_v12, -inf }
 0x1df   : > { %1407 = vmax.xlane.f32.xlu0 %v2339_v13  ;;  %989 = vmax.xlane.f32.xlu1 %v2343_v14  ;;  %v2165_v16 = vpop.f32.mrb[10].mxu1  ;;  %v2352_v17 = vsel %vm2284_vm3, %v2345_v15, -inf  ;;  %v2357_v18 = vsel %vm2301_vm7, %v2345_v15, -inf  ;;  %v2521_v58 = vsel %vm565_vm4, %v2345_v15, -inf }
 0x1e0   : > { %v534_v19 = vpop.f32.mrb[11].mxu1  ;;  %v2492_v53 = vsel %vm565_vm4, %v2165_v16, -inf  ;;  %v2503_v55 = vsel %vm2284_vm3, %v2165_v16, -inf  ;;  %v2514_v59 = vsel %vm2301_vm7, %v2165_v16, -inf }
 0x1e1   : > { %v2361_v20 = vsel %vm2284_vm3, %v534_v19, -inf  ;;  %v2365_v21 = vsel %vm2301_vm7, %v534_v19, -inf  ;;  %v2525_v60 = vsel %vm565_vm4, %v534_v19, -inf }
 0x1e3   : > { %1409 = vmax.xlane.f32.xlu1 %v2369_v22  ;;  %585 = vmax.xlane.f32.xlu0 %v2373_v23 }
 0x1e5   : > { %v2168_v26 = vpop.f32.mrb[12].mxu1 }
 0x1e6   : > { %v547_v27 = vpop.f32.mrb[13].mxu1  ;;  %v2387_v28 = vsel %vm565_vm4, %v2168_v26, -inf  ;;  %v2391_v29 = vsel %vm2284_vm3, %v2168_v26, -inf  ;;  %v2395_v30 = vsel %vm2301_vm7, %v2168_v26, -inf }
 0x1e7   : > { %595 = vmax.xlane.f32.xlu0 %v2379_v24  ;;  %597 = vmax.xlane.f32.xlu1 %v2383_v25  ;;  %v2169_v31 = vpop.f32.mrb[14].mxu1  ;;  %v2401_v32 = vsel %vm565_vm4, %v547_v27, -inf  ;;  %v2405_v33 = vsel %vm2284_vm3, %v547_v27, -inf  ;;  %v2409_v34 = vsel %vm2301_vm7, %v547_v27, -inf }
 0x1e8   : > { %v2413_v35 = vsel %vm565_vm4, %v2169_v31, -inf  ;;  %v2417_v36 = vsel %vm2284_vm3, %v2169_v31, -inf  ;;  %v2421_v37 = vsel %vm2301_vm7, %v2169_v31, -inf  ;;  %v550_v38 = vpop.f32.mrb[15].mxu1 }
 0x1e9   : > { %v2425_v39 = vsel %vm565_vm4, %v550_v38, -inf  ;;  %v2429_v40 = vsel %vm2284_vm3, %v550_v38, -inf  ;;  %v2433_v41 = vsel %vm2301_vm7, %v550_v38, -inf }
 0x1eb   : > { %999 = vmax.xlane.f32.xlu0 %v2437_v42  ;;  %1001 = vmax.xlane.f32.xlu1 %v2441_v43 }
 0x1ef   : > { %1419 = vmax.xlane.f32.xlu0 %v2447_v44  ;;  %1421 = vmax.xlane.f32.xlu1 %v2451_v45 }
 0x1f3   : > { %591 = vmax.xlane.f32.xlu0 %v2457_v46  ;;  %593 = vmax.xlane.f32.xlu1 %v2461_v47 }
 0x1f7   : > { %995 = vmax.xlane.f32.xlu0 %v2467_v48  ;;  %997 = vmax.xlane.f32.xlu1 %v2471_v49 }
 0x1fb   : > { %1415 = vmax.xlane.f32.xlu0 %v2477_v50  ;;  %1417 = vmax.xlane.f32.xlu1 %v2481_v51 }
 0x1ff   : > { %603 = vmax.xlane.f32.xlu0 %v2488_v52  ;;  %605 = vmax.xlane.f32.xlu1 %v2492_v53 }
 0x203   : > { %1007 = vmax.xlane.f32.xlu0 %v2499_v54  ;;  %1009 = vmax.xlane.f32.xlu1 %v2503_v55 }
 0x207   : > { %1427 = vmax.xlane.f32.xlu0 %v2510_v56  ;;  %1429 = vmax.xlane.f32.xlu1 %v2514_v59 }
 0x20b   : > { %599 = vmax.xlane.f32.xlu0 %v2521_v58  ;;  %601 = vmax.xlane.f32.xlu1 %v2525_v60 }
 0x20f   : > { %1003 = vmax.xlane.f32.xlu0 %v2352_v17  ;;  %1005 = vmax.xlane.f32.xlu1 %v2361_v20 }
 0x213   : > { %1423 = vmax.xlane.f32.xlu0 %v2357_v18  ;;  %1425 = vmax.xlane.f32.xlu1 %v2365_v21 }
 0x217   : > { %611 = vmax.xlane.f32.xlu0 %v2387_v28  ;;  %613 = vmax.xlane.f32.xlu1 %v2413_v35 }
 0x21b   : > { %1015 = vmax.xlane.f32.xlu0 %v2391_v29  ;;  %1017 = vmax.xlane.f32.xlu1 %v2417_v36 }
 0x21f   : > { %1435 = vmax.xlane.f32.xlu0 %v2395_v30  ;;  %1437 = vmax.xlane.f32.xlu1 %v2421_v37 }
 0x223   : > { %607 = vmax.xlane.f32.xlu0 %v2401_v32  ;;  %609 = vmax.xlane.f32.xlu1 %v2425_v39 }
 0x227   : > { %1011 = vmax.xlane.f32.xlu0 %v2405_v33  ;;  %1013 = vmax.xlane.f32.xlu1 %v2429_v40 }
 0x22b   : > { %1431 = vmax.xlane.f32.xlu0 %v2409_v34  ;;  %1433 = vmax.xlane.f32.xlu1 %v2433_v41 }
 0x25c   : > { %v992_v63 = vpop.xlane.xlu0 %991  ;;  %v588_v0 = vpop.xlane.xlu1 %587 }
 0x25d   : > { %vm1021_vm8 = vcmp.eq.f32.partialorder %v2293_v61, %v992_v63  ;;  %vm617_vm9 = vcmp.eq.f32.partialorder %v2297_v62, %v588_v0 }
 0x25e   : > { %v2548_v1 = vsel %vm1021_vm8, %v2280_v57, 128  ;;  %v2551_v4 = vsel %vm617_vm9, %v2280_v57, 128 }
 0x25f   : > { %v676_v7 = vshra.s32 %v2551_v4, 16  ;;  %v1080_v8 = vshra.s32 %v2548_v1, 16 }
 0x260   : > { %v1412_v9 = vpop.xlane.xlu0 %1411  ;;  %v590_v12 = vpop.xlane.xlu1 %589 }
 0x261   : > { %vm1441_vm10 = vcmp.eq.f32.partialorder %v2307_v2, %v1412_v9  ;;  %v2556_v15 = vcvt.s32.f32 %v676_v7  ;;  %v2558_v16 = vcvt.s32.f32 %v1080_v8  ;;  %vm618_vm11 = vcmp.eq.f32.partialorder %v2311_v3, %v590_v12 }
 0x262   : > { %v2561_v61 = vsel %vm1441_vm10, %v2280_v57, 128  ;;  %v2571_v27 = vsel %vm618_vm11, %v2280_v57, 128 }
 0x263   : > { %679 = vmin.xlane.f32.xlu0 %v2556_v15  ;;  %1083 = vmin.xlane.f32.xlu1 %v2558_v16  ;;  %v1500_v62 = vshra.s32 %v2561_v61, 16 }
 0x264   : > { %v584_v19 = vpop.xlane.xlu0 %583  ;;  %v994_v26 = vpop.xlane.xlu1 %993 }
 0x265   : > { %vm615_vm12 = vcmp.eq.f32.partialorder %v2317_v5, %v584_v19  ;;  %v2568_v2 = vcvt.s32.f32 %v1500_v62  ;;  %vm1022_vm13 = vcmp.eq.f32.partialorder %v2321_v6, %v994_v26  ;;  %v690_v5 = vshra.s32 %v2571_v27, 16 }
 0x266   : > { %v2574_v31 = vsel %vm615_vm12, %v2280_v57, 128  ;;  %v2584_v7 = vsel %vm1022_vm13, %v2280_v57, 128 }
 0x267   : > { %1503 = vmin.xlane.f32.xlu1 %v2568_v2  ;;  %v648_v3 = vshra.s32 %v2574_v31, 16  ;;  %3627 = vst [vmem:[#allocation3_spill] sm:$0xff] %v2584_v7  ;;  %v1094_v19 = vshra.s32 %v2584_v7, 16 }
 0x268   : > { %v988_v38 = vpop.xlane.xlu0 %987  ;;  %v1414_v63 = vpop.xlane.xlu1 %1413 }
 0x269   : > { %vm1019_vm14 = vcmp.eq.f32.partialorder %v2327_v10, %v988_v38  ;;  %v2580_v0 = vcvt.s32.f32 %v648_v3  ;;  %vm1442_vm15 = vcmp.eq.f32.partialorder %v2331_v11, %v1414_v63  ;;  %v2593_v10 = vcvt.s32.f32 %v690_v5 }
 0x26a   : > { %v2587_v8 = vsel %vm1019_vm14, %v2280_v57, 128  ;;  %v2599_v26 = vsel %vm1442_vm15, %v2280_v57, 128  ;;  %v2608_v63 = vcvt.s32.f32 %v1094_v19 }
 0x26b   : > { %651 = vmin.xlane.f32.xlu0 %v2580_v0  ;;  %v1052_v6 = vshra.s32 %v2587_v8, 16  ;;  %3628 = vst [vmem:[#allocation4_spill] sm:$0xff] %v2593_v10 }
 0x26c   : > { %v1408_v9 = vpop.xlane.xlu0 %1407  ;;  %v990_v12 = vpop.xlane.xlu1 %989  ;;  %3630 = vst [vmem:[#allocation6_spill] sm:$0xff] %v2608_v63 }
 0x26d   : > { %vm1439_vm0 = vcmp.eq.f32.partialorder %v2339_v13, %v1408_v9  ;;  %v2595_v62 = vcvt.s32.f32 %v1052_v6  ;;  %v1514_v6 = vshra.s32 %v2599_v26, 16  ;;  %vm1020_vm2 = vcmp.eq.f32.partialorder %v2343_v14, %v990_v12 }
 0x26e   : > { %v2602_v3 = vsel %vm1439_vm0, %v2280_v57, 128  ;;  %v2623_v19 = vsel %vm1020_vm2, %v2280_v57, 128 }
 0x26f   : > { %3629 = vst [vmem:[#allocation5_spill] sm:$0xff] %v2595_v62  ;;  %693 = vmin.xlane.f32.xlu0 %v2593_v10  ;;  %1055 = vmin.xlane.f32.xlu1 %v2595_v62  ;;  %v1472_v11 = vshra.s32 %v2602_v3, 16  ;;  %v2619_v7 = vcvt.s32.f32 %v1514_v6  ;;  %3633 = vst [vmem:[#allocation9_spill] sm:$0xff] %v2623_v19  ;;  %v1066_v12 = vshra.s32 %v2623_v19, 16 }
 0x270   : > { %v1410_v38 = vpop.xlane.xlu1 %1409  ;;  %v586_v13 = vpop.xlane.xlu0 %585 }
 0x271   : > { %vm616_vm1 = vcmp.eq.f32.partialorder %v2373_v23, %v586_v13  ;;  %v2610_v5 = vcvt.s32.f32 %v1472_v11  ;;  %3632 = vst [vmem:[#allocation8_spill] sm:$0xff] %v2619_v7  ;;  %vm1440_vm3 = vcmp.eq.f32.partialorder %v2369_v22, %v1410_v38 }
 0x272   : > { %v2614_v9 = vsel %vm616_vm1, %v2280_v57, 128  ;;  %v2632_v6 = vsel %vm1440_vm3, %v2280_v57, 128 }
 0x273   : > { %3631 = vst [vmem:[#allocation7_spill] sm:$0xff] %v2614_v9  ;;  %1097 = vmin.xlane.f32.xlu0 %v2608_v63  ;;  %1475 = vmin.xlane.f32.xlu1 %v2610_v5  ;;  %v662_v23 = vshra.s32 %v2614_v9, 16  ;;  %3634 = vst [vmem:[#allocation10_spill] sm:$0xff] %v2632_v6 }
 0x274   : > { %v596_v10 = vpop.xlane.xlu0 %595  ;;  %v598_v62 = vpop.xlane.xlu1 %597 }
 0x275   : > { %v2628_v14 = vcvt.s32.f32 %v662_v23  ;;  %vm621_vm5 = vcmp.eq.f32.partialorder %v2379_v24, %v596_v10  ;;  %vm622_vm8 = vcmp.eq.f32.partialorder %v2383_v25, %v598_v62 }
 0x276   : > { %v2647_v19 = vsel %vm621_vm5, %v2280_v57, 128 }
 0x277   : > { %1517 = vmin.xlane.f32.xlu0 %v2619_v7 }
 0x278   : > { %v1000_v11 = vpop.xlane.xlu0 %999  ;;  %v1002_v13 = vpop.xlane.xlu1 %1001 }
 0x279   : > { %vm1025_vm4 = vcmp.eq.f32.partialorder %v2437_v42, %v1000_v11  ;;  %v2641_v42 = vcvt.s32.f32 %v1066_v12  ;;  %v1486_v11 = vshra.s32 %v2632_v6, 16  ;;  %vm1026_vm10 = vcmp.eq.f32.partialorder %v2441_v43, %v1002_v13 }
 0x27a   : > { %v2635_v9 = vsel %vm1025_vm4, %v2280_v57, 128 }
 0x27b   : > { %665 = vmin.xlane.f32.xlu0 %v2628_v14  ;;  %v1136_v22 = vshra.s32 %v2635_v9, 16  ;;  %3635 = vst [vmem:[#allocation11_spill] sm:$0xff] %v2641_v42  ;;  %v2656_v12 = vcvt.s32.f32 %v1486_v11 }
 0x27c   : > { %v1420_v38 = vpop.xlane.xlu0 %1419  ;;  %v1422_v7 = vpop.xlane.xlu1 %1421 }
 0x27d   : > { %vm1445_vm6 = vcmp.eq.f32.partialorder %v2447_v44, %v1420_v38  ;;  %v2643_v23 = vcvt.s32.f32 %v1136_v22  ;;  %3637 = vst [vmem:[#allocation13_spill] sm:$0xff] %v2656_v12  ;;  %v732_v38 = vshra.s32 %v2647_v19, 16  ;;  %vm1446_vm12 = vcmp.eq.f32.partialorder %v2451_v45, %v1422_v7 }
 0x27e   : > { %v2650_v63 = vsel %vm1445_vm6, %v2280_v57, 128 }
 0x27f   : > { %3636 = vst [vmem:[#allocation12_spill] sm:$0xff] %v2643_v23  ;;  %1069 = vmin.xlane.f32.xlu0 %v2641_v42  ;;  %1139 = vmin.xlane.f32.xlu1 %v2643_v23  ;;  %v1556_v24 = vshra.s32 %v2650_v63, 16 }
 0x280   : > { %v592_v10 = vpop.xlane.xlu0 %591  ;;  %v594_v44 = vpop.xlane.xlu1 %593 }
 0x281   : > { %vm619_vm7 = vcmp.eq.f32.partialorder %v2457_v46, %v592_v10  ;;  %v2658_v22 = vcvt.s32.f32 %v1556_v24  ;;  %v2668_v46 = vcvt.s32.f32 %v732_v38  ;;  %v2672_v24 = vsel %vm622_vm8, %v2280_v57, 128 }
 0x282   : > { %v2662_v6 = vsel %vm619_vm7, %v2280_v57, 128  ;;  %3640 = vst [vmem:[#allocation16_spill] sm:$0xff] %v2672_v24  ;;  %v746_v38 = vshra.s32 %v2672_v24, 16  ;;  %v2703_v24 = vsel %vm1446_vm12, %v2280_v57, 128  ;;  %vm620_vm14 = vcmp.eq.f32.partialorder %v2461_v47, %v594_v44 }
 0x283   : > { %3638 = vst [vmem:[#allocation14_spill] sm:$0xff] %v2658_v22  ;;  %3639 = vst [vmem:[#allocation15_spill] sm:$0xff] %v2662_v6  ;;  %1489 = vmin.xlane.f32.xlu0 %v2656_v12  ;;  %1559 = vmin.xlane.f32.xlu1 %v2658_v22  ;;  %v704_v11 = vshra.s32 %v2662_v6, 16  ;;  %v2687_v6 = vsel %vm1026_vm10, %v2280_v57, 128 }
 0x284   : > { %v996_v23 = vpop.xlane.xlu0 %995  ;;  %v998_v42 = vpop.xlane.xlu1 %997  ;;  %3642 = vst [vmem:[#allocation18_spill] sm:$0xff] %v2687_v6  ;;  %3644 = vst [vmem:[#allocation20_spill] sm:$0xff] %v2703_v24 }
 0x285   : > { %vm1023_vm9 = vcmp.eq.f32.partialorder %v2467_v48, %v996_v23  ;;  %v2681_v48 = vcvt.s32.f32 %v704_v11  ;;  %v2697_v11 = vcvt.s32.f32 %v746_v38  ;;  %vm1024_vm0 = vcmp.eq.f32.partialorder %v2471_v49, %v998_v42 }
 0x286   : > { %v2675_v10 = vsel %vm1023_vm9, %v2280_v57, 128 }
 0x287   : > { %735 = vmin.xlane.f32.xlu0 %v2668_v46  ;;  %v1108_v25 = vshra.s32 %v2675_v10, 16 }
 0x288   : > { %v1416_v62 = vpop.xlane.xlu0 %1415  ;;  %v1418_v22 = vpop.xlane.xlu1 %1417 }
 0x289   : > { %vm1443_vm11 = vcmp.eq.f32.partialorder %v2477_v50, %v1416_v62  ;;  %v2683_v23 = vcvt.s32.f32 %v1108_v25  ;;  %v1150_v62 = vshra.s32 %v2687_v6, 16  ;;  %v1570_v6 = vshra.s32 %v2703_v24, 16 }
 0x28a   : > { %v2690_v12 = vsel %vm1443_vm11, %v2280_v57, 128  ;;  %vm1444_vm2 = vcmp.eq.f32.partialorder %v2481_v51, %v1418_v22 }
 0x28b   : > { %3641 = vst [vmem:[#allocation17_spill] sm:$0xff] %v2683_v23  ;;  %707 = vmin.xlane.f32.xlu0 %v2681_v48  ;;  %1111 = vmin.xlane.f32.xlu1 %v2683_v23  ;;  %v1528_v43 = vshra.s32 %v2690_v12, 16  ;;  %v2719_v23 = vsel %vm620_vm14, %v2280_v57, 128 }
 0x28c   : > { %v604_v50 = vpop.xlane.xlu0 %603  ;;  %v606_v13 = vpop.xlane.xlu1 %605  ;;  %3646 = vst [vmem:[#allocation22_spill] sm:$0xff] %v2719_v23  ;;  %v718_v24 = vshra.s32 %v2719_v23, 16 }
 0x28d   : > { %vm625_vm13 = vcmp.eq.f32.partialorder %v2488_v52, %v604_v50  ;;  %v2699_v25 = vcvt.s32.f32 %v1528_v43  ;;  %v2713_v43 = vcvt.s32.f32 %v1150_v62  ;;  %vm626_vm4 = vcmp.eq.f32.partialorder %v2492_v53, %v606_v13 }
 0x28e   : > { %v2706_v45 = vsel %vm625_vm13, %v2280_v57, 128 }
 0x28f   : > { %3643 = vst [vmem:[#allocation19_spill] sm:$0xff] %v2699_v25  ;;  %749 = vmin.xlane.f32.xlu0 %v2697_v11  ;;  %1531 = vmin.xlane.f32.xlu1 %v2699_v25  ;;  %v788_v52 = vshra.s32 %v2706_v45, 16  ;;  %v2735_v25 = vsel %vm1024_vm0, %v2280_v57, 128 }
 0x290   : > { %v1008_v7 = vpop.xlane.xlu0 %1007  ;;  %v1010_v38 = vpop.xlane.xlu1 %1009  ;;  %3648 = vst [vmem:[#allocation24_spill] sm:$0xff] %v2735_v25  ;;  %v1122_v23 = vshra.s32 %v2735_v25, 16 }
 0x291   : > { %vm1029_vm15 = vcmp.eq.f32.partialorder %v2499_v54, %v1008_v7  ;;  %v2715_v50 = vcvt.s32.f32 %v788_v52  ;;  %v2729_v52 = vcvt.s32.f32 %v1570_v6  ;;  %vm1030_vm6 = vcmp.eq.f32.partialorder %v2503_v55, %v1010_v38 }
 0x292   : > { %v2722_v47 = vsel %vm1029_vm15, %v2280_v57, 128 }
 0x293   : > { %3645 = vst [vmem:[#allocation21_spill] sm:$0xff] %v2715_v50  ;;  %1153 = vmin.xlane.f32.xlu0 %v2713_v43  ;;  %791 = vmin.xlane.f32.xlu1 %v2715_v50  ;;  %v1192_v54 = vshra.s32 %v2722_v47, 16  ;;  %v2751_v50 = vsel %vm1444_vm2, %v2280_v57, 128 }
 0x294   : > { %v1428_v44 = vpop.xlane.xlu0 %1427  ;;  %v1430_v62 = vpop.xlane.xlu1 %1429  ;;  %3650 = vst [vmem:[#allocation26_spill] sm:$0xff] %v2751_v50  ;;  %v1542_v25 = vshra.s32 %v2751_v50, 16 }
 0x295   : > { %vm1449_vm1 = vcmp.eq.f32.partialorder %v2510_v56, %v1428_v44  ;;  %v2731_v7 = vcvt.s32.f32 %v1192_v54  ;;  %v2745_v54 = vcvt.s32.f32 %v718_v24  ;;  %vm1450_vm8 = vcmp.eq.f32.partialorder %v2514_v59, %v1430_v62 }
 0x296   : > { %v2738_v49 = vsel %vm1449_vm1, %v2280_v57, 128 }
 0x297   : > { %3647 = vst [vmem:[#allocation23_spill] sm:$0xff] %v2731_v7  ;;  %1573 = vmin.xlane.f32.xlu0 %v2729_v52  ;;  %1195 = vmin.xlane.f32.xlu1 %v2731_v7  ;;  %v1612_v56 = vshra.s32 %v2738_v49, 16  ;;  %v2767_v7 = vsel %vm626_vm4, %v2280_v57, 128 }
 0x298   : > { %v600_v6 = vpop.xlane.xlu0 %599  ;;  %v602_v42 = vpop.xlane.xlu1 %601  ;;  %3651 = vst [vmem:[#allocation27_spill] sm:$0xff] %v2767_v7  ;;  %v802_v50 = vshra.s32 %v2767_v7, 16  ;;  %v2799_v7 = vsel %vm1450_vm8, %v2280_v57, 128 }
 0x299   : > { %vm623_vm3 = vcmp.eq.f32.partialorder %v2521_v58, %v600_v6  ;;  %v2747_v44 = vcvt.s32.f32 %v1612_v56  ;;  %v2761_v56 = vcvt.s32.f32 %v1122_v23  ;;  %3655 = vst [vmem:[#allocation31_spill] sm:$0xff] %v2799_v7  ;;  %vm624_vm10 = vcmp.eq.f32.partialorder %v2525_v60, %v602_v42 }
 0x29a   : > { %v2754_v51 = vsel %vm623_vm3, %v2280_v57, 128  ;;  %v2793_v38 = vcvt.s32.f32 %v802_v50 }
 0x29b   : > { %3649 = vst [vmem:[#allocation25_spill] sm:$0xff] %v2747_v44  ;;  %721 = vmin.xlane.f32.xlu0 %v2745_v54  ;;  %1615 = vmin.xlane.f32.xlu1 %v2747_v44  ;;  %v760_v58 = vshra.s32 %v2754_v51, 16  ;;  %v2783_v44 = vsel %vm1030_vm6, %v2280_v57, 128 }
 0x29c   : > { %v1004_v22 = vpop.xlane.xlu0 %1003  ;;  %v1006_v24 = vpop.xlane.xlu1 %1005  ;;  %3653 = vst [vmem:[#allocation29_spill] sm:$0xff] %v2783_v44 }
 0x29d   : > { %vm1027_vm5 = vcmp.eq.f32.partialorder %v2352_v17, %v1004_v22  ;;  %v2763_v6 = vcvt.s32.f32 %v760_v58  ;;  %v2777_v58 = vcvt.s32.f32 %v1542_v25  ;;  %vm1028_vm12 = vcmp.eq.f32.partialorder %v2361_v20, %v1006_v24 }
 0x29e   : > { %v2770_v53 = vsel %vm1027_vm5, %v2280_v57, 128 }
 0x29f   : > { %1125 = vmin.xlane.f32.xlu0 %v2761_v56  ;;  %763 = vmin.xlane.f32.xlu1 %v2763_v6  ;;  %v1164_v17 = vshra.s32 %v2770_v53, 16 }
 0x2a0   : > { %v1424_v23 = vpop.xlane.xlu0 %1423  ;;  %v1426_v13 = vpop.xlane.xlu1 %1425 }
 0x2a1   : > { %vm1447_vm7 = vcmp.eq.f32.partialorder %v2357_v18, %v1424_v23  ;;  %v2779_v22 = vcvt.s32.f32 %v1164_v17  ;;  %v1206_v23 = vshra.s32 %v2783_v44, 16  ;;  %v1626_v44 = vshra.s32 %v2799_v7, 16 }
 0x2a2   : > { %v2786_v55 = vsel %vm1447_vm7, %v2280_v57, 128  ;;  %vm1448_vm14 = vcmp.eq.f32.partialorder %v2365_v21, %v1426_v13 }
 0x2a3   : > { %3652 = vst [vmem:[#allocation28_spill] sm:$0xff] %v2779_v22  ;;  %1545 = vmin.xlane.f32.xlu0 %v2777_v58  ;;  %1167 = vmin.xlane.f32.xlu1 %v2779_v22  ;;  %v1584_v18 = vshra.s32 %v2786_v55, 16  ;;  %v2815_v22 = vsel %vm624_vm10, %v2280_v57, 128 }
 0x2a4   : > { %v612_v25 = vpop.xlane.xlu0 %611  ;;  %v614_v62 = vpop.xlane.xlu1 %613  ;;  %3657 = vst [vmem:[#allocation33_spill] sm:$0xff] %v2815_v22  ;;  %v774_v7 = vshra.s32 %v2815_v22, 16  ;;  %v2847_v22 = vsel %vm1448_vm14, %v2280_v57, 128 }
 0x2a5   : > { %vm629_vm9 = vcmp.eq.f32.partialorder %v2387_v28, %v612_v25  ;;  %v2795_v17 = vcvt.s32.f32 %v1584_v18  ;;  %v2809_v18 = vcvt.s32.f32 %v1206_v23  ;;  %3660 = vst [vmem:[#allocation36_spill] sm:$0xff] %v2847_v22  ;;  %vm630_vm0 = vcmp.eq.f32.partialorder %v2413_v35, %v614_v62 }
 0x2a6   : > { %v2802_v59 = vsel %vm629_vm9, %v2280_v57, 128  ;;  %v2841_v24 = vcvt.s32.f32 %v774_v7 }
 0x2a7   : > { %3654 = vst [vmem:[#allocation30_spill] sm:$0xff] %v2795_v17  ;;  %805 = vmin.xlane.f32.xlu0 %v2793_v38  ;;  %1587 = vmin.xlane.f32.xlu1 %v2795_v17  ;;  %v844_v28 = vshra.s32 %v2802_v59, 16  ;;  %v2831_v17 = vsel %vm1028_vm12, %v2280_v57, 128 }
 0x2a8   : > { %v1016_v50 = vpop.xlane.xlu0 %1015  ;;  %v1018_v42 = vpop.xlane.xlu1 %1017 }
 0x2a9   : > { %vm1033_vm11 = vcmp.eq.f32.partialorder %v2391_v29, %v1016_v50  ;;  %v2811_v25 = vcvt.s32.f32 %v844_v28  ;;  %v2825_v28 = vcvt.s32.f32 %v1626_v44  ;;  %vm1034_vm2 = vcmp.eq.f32.partialorder %v2417_v36, %v1018_v42 }
 0x2aa   : > { %v2818_v60 = vsel %vm1033_vm11, %v2280_v57, 128 }
 0x2ab   : > { %3656 = vst [vmem:[#allocation32_spill] sm:$0xff] %v2811_v25  ;;  %1209 = vmin.xlane.f32.xlu0 %v2809_v18  ;;  %847 = vmin.xlane.f32.xlu1 %v2811_v25  ;;  %v1248_v29 = vshra.s32 %v2818_v60, 16 }
 0x2ac   : > { %v1436_v23 = vpop.xlane.xlu0 %1435  ;;  %v1438_v25 = vpop.xlane.xlu1 %1437 }
 0x2ad   : > { %vm1453_vm13 = vcmp.eq.f32.partialorder %v2395_v30, %v1436_v23  ;;  %v2827_v50 = vcvt.s32.f32 %v1248_v29  ;;  %v1178_v23 = vshra.s32 %v2831_v17, 16  ;;  %vm1454_vm4 = vcmp.eq.f32.partialorder %v2421_v37, %v1438_v25 }
 0x2ae   : > { %v2834_v20 = vsel %vm1453_vm13, %v2280_v57, 128 }
 0x2af   : > { %3658 = vst [vmem:[#allocation34_spill] sm:$0xff] %v2834_v20  ;;  %1629 = vmin.xlane.f32.xlu0 %v2825_v28  ;;  %1251 = vmin.xlane.f32.xlu1 %v2827_v50  ;;  %v1668_v30 = vshra.s32 %v2834_v20, 16  ;;  %v2857_v13 = vcvt.s32.f32 %v1178_v23  ;;  %v2863_v20 = vsel %vm630_vm0, %v2280_v57, 128 }
 0x2b0   : > { %v608_v44 = vpop.xlane.xlu0 %607  ;;  %3661 = vst [vmem:[#allocation37_spill] sm:$0xff] %v2863_v20  ;;  %v610_v62 = vpop.xlane.xlu1 %609 }
 0x2b1   : > { %vm627_vm15 = vcmp.eq.f32.partialorder %v2401_v32, %v608_v44  ;;  %v2843_v29 = vcvt.s32.f32 %v1668_v30  ;;  %v1598_v44 = vshra.s32 %v2847_v22, 16  ;;  %v2879_v22 = vsel %vm1034_vm2, %v2280_v57, 128 }
 0x2b2   : > { %v2850_v21 = vsel %vm627_vm15, %v2280_v57, 128  ;;  %3663 = vst [vmem:[#allocation39_spill] sm:$0xff] %v2879_v22  ;;  %vm628_vm5 = vcmp.eq.f32.partialorder %v2425_v39, %v610_v62 }
 0x2b3   : > { %3659 = vst [vmem:[#allocation35_spill] sm:$0xff] %v2843_v29  ;;  %777 = vmin.xlane.f32.xlu0 %v2841_v24  ;;  %1671 = vmin.xlane.f32.xlu1 %v2843_v29  ;;  %v816_v32 = vshra.s32 %v2850_v21, 16  ;;  %v858_v29 = vshra.s32 %v2863_v20, 16 }
 0x2b4   : > { %v1012_v7 = vpop.xlane.xlu0 %1011  ;;  %v1014_v20 = vpop.xlane.xlu1 %1013 }
 0x2b5   : > { %vm1031_vm1 = vcmp.eq.f32.partialorder %v2405_v33, %v1012_v7  ;;  %v2859_v30 = vcvt.s32.f32 %v816_v32  ;;  %v2873_v32 = vcvt.s32.f32 %v1598_v44  ;;  %v2888_v42 = vcvt.s32.f32 %v858_v29 }
 0x2b6   : > { %v2866_v35 = vsel %vm1031_vm1, %v2280_v57, 128  ;;  %v2903_v29 = vsel %vm628_vm5, %v2280_v57, 128  ;;  %vm1032_vm6 = vcmp.eq.f32.partialorder %v2429_v40, %v1014_v20 }
 0x2b7   : > { %1181 = vmin.xlane.f32.xlu0 %v2857_v13  ;;  %819 = vmin.xlane.f32.xlu1 %v2859_v30  ;;  %v1220_v33 = vshra.s32 %v2866_v35, 16  ;;  %v2911_v39 = vsel %vm1032_vm6, %v2280_v57, 128 }
 0x2b8   : > { %v1432_v23 = vpop.xlane.xlu0 %1431  ;;  %v1234_v62 = vshra.s32 %v2911_v39, 16 }
 0x2b9   : > { %vm1451_vm3 = vcmp.eq.f32.partialorder %v2409_v34, %v1432_v23  ;;  %v2875_v7 = vcvt.s32.f32 %v1220_v33  ;;  %v1262_v33 = vshra.s32 %v2879_v22, 16  ;;  %v2894_v23 = vsel %vm1454_vm4, %v2280_v57, 128 }
 0x2ba   : > { %v2882_v36 = vsel %vm1451_vm3, %v2280_v57, 128  ;;  %3664 = vst [vmem:[#allocation40_spill] sm:$0xff] %v2894_v23  ;;  %v1682_v25 = vshra.s32 %v2894_v23, 16  ;;  %v830_v22 = vshra.s32 %v2903_v29, 16 }
 0x2bb   : > { %3662 = vst [vmem:[#allocation38_spill] sm:$0xff] %v2875_v7  ;;  %1601 = vmin.xlane.f32.xlu0 %v2873_v32  ;;  %1223 = vmin.xlane.f32.xlu1 %v2875_v7  ;;  %v1640_v34 = vshra.s32 %v2882_v36, 16  ;;  %v2899_v37 = vcvt.s32.f32 %v1262_v33 }
 0x2bc   : > { %v2908_v7 = vcvt.s32.f32 %v1682_v25  ;;  %v2916_v33 = vcvt.s32.f32 %v830_v22  ;;  %v2923_v25 = vcvt.s32.f32 %v1234_v62  ;;  %v675_v22 = vand.u32 65535, %v2551_v4 }
 0x2bd   : > { %v2890_v44 = vcvt.s32.f32 %v1640_v34  ;;  %v1434_v34 = vpop.xlane.xlu1 %1433 }
 0x2be   : > { %3665 = vst [vmem:[#allocation41_spill] sm:$0xff] %v2908_v7  ;;  %vm1452_vm7 = vcmp.eq.f32.partialorder %v2433_v41, %v1434_v34  ;;  %3666 = vst [vmem:[#allocation42_spill] sm:$0xff] %v2916_v33  ;;  %v1079_v41 = vand.u32 65535, %v2548_v1  ;;  %v1499_v34 = vand.u32 65535, %v2561_v61  ;;  %v647_v61 = vand.u32 65535, %v2574_v31 }
 0x2bf   : > { %861 = vmin.xlane.f32.xlu0 %v2888_v42  ;;  %1643 = vmin.xlane.f32.xlu1 %v2890_v44  ;;  %v2919_v40 = vsel %vm1452_vm7, %v2280_v57, 128 }
 0x2c0   : > { %3667 = vst [vmem:[#allocation43_spill] sm:$0xff] %v2919_v40  ;;  %v1654_v20 = vshra.s32 %v2919_v40, 16  ;;  %v1081_v40 = vcvt.s32.f32 %v1079_v41  ;;  %v1501_v4 = vcvt.s32.f32 %v1499_v34  ;;  %v1051_v41 = vand.u32 65535, %v2587_v8 }
 0x2c2   : > { %v2926_v23 = vcvt.s32.f32 %v1654_v20 }
 0x2c3   : > { %1265 = vmin.xlane.f32.xlu0 %v2899_v37 }
 0x2c7   : > { %1685 = vmin.xlane.f32.xlu0 %v2908_v7 }
 0x2cb   : > { %833 = vmin.xlane.f32.xlu0 %v2916_v33  ;;  %v677_v33 = vcvt.s32.f32 %v675_v22 }
 0x2cf   : > { %1237 = vmin.xlane.f32.xlu0 %v2923_v25 }
 0x2d3   : > { %1657 = vmin.xlane.f32.xlu0 %v2926_v23 }
 0x2f0   : > { %v2932_v57 = vpop.xlane.xlu0 %679  ;;  %v2934_v7 = vpop.xlane.xlu1 %1083 }
 0x2f1   : > { %3668 = vst [vmem:[#allocation44_spill] sm:$0xff] %v2934_v7  ;;  %vm1085_vm8 = vcmp.eq.f32.partialorder %v2558_v16, %v2934_v7  ;;  %vm681_vm9 = vcmp.eq.f32.partialorder %v2556_v15, %v2932_v57  ;;  %v649_v7 = vcvt.s32.f32 %v647_v61  ;;  %v689_v15 = vand.u32 65535, %v2571_v27  ;;  %v3671_v27 = vld [vmem:[#allocation4_spill] sm:$0xff] }
 0x2f2   : > { %v682_v62 = vsel %vm681_vm9, %v677_v33, inf  ;;  %v1086_v20 = vsel %vm1085_vm8, %v1081_v40, inf  ;;  %v1471_v40 = vand.u32 65535, %v2602_v3 }
 0x2f3   : > { %683 = vmin.xlane.f32.xlu1 %v682_v62  ;;  %1087 = vmin.xlane.f32.xlu0 %v1086_v20  ;;  %v1053_v62 = vcvt.s32.f32 %v1051_v41  ;;  %v3669_v20 = vld [vmem:[#allocation3_spill] sm:$0xff]  ;;  %v1513_v41 = vand.u32 65535, %v2599_v26  ;;  %v3676_v26 = vld [vmem:[#allocation9_spill] sm:$0xff] }
 0x2f4   : > { %v2940_v1 = vpop.xlane.xlu1 %1503  ;;  %v1093_v8 = vand.u32 65535, %v3669_v20 }
 0x2f5   : > { %vm1505_vm10 = vcmp.eq.f32.partialorder %v2568_v2, %v2940_v1  ;;  %v691_v2 = vcvt.s32.f32 %v689_v15  ;;  %v3673_v15 = vld [vmem:[#allocation6_spill] sm:$0xff] }
 0x2f6   : > { %v1506_v22 = vsel %vm1505_vm10, %v1501_v4, inf  ;;  %v3670_v4 = vld [vmem:[#allocation5_spill] sm:$0xff] }
 0x2f7   : > { %1507 = vmin.xlane.f32.xlu0 %v1506_v22  ;;  %v1095_v22 = vcvt.s32.f32 %v1093_v8  ;;  %v3675_v8 = vld [vmem:[#allocation8_spill] sm:$0xff] }
 0x2f8   : > { %v2946_v16 = vpop.xlane.xlu0 %651 }
 0x2f9   : > { %vm653_vm11 = vcmp.eq.f32.partialorder %v2580_v0, %v2946_v16 }
 0x2fa   : > { %v654_v33 = vsel %vm653_vm11, %v649_v7, inf }
 0x2fb   : > { %655 = vmin.xlane.f32.xlu1 %v654_v33  ;;  %v1473_v33 = vcvt.s32.f32 %v1471_v40 }
 0x2fc   : > { %v2952_v31 = vpop.xlane.xlu0 %693  ;;  %v2954_v34 = vpop.xlane.xlu1 %1055 }
 0x2fd   : > { %vm1057_vm12 = vcmp.eq.f32.partialorder %v3670_v4, %v2954_v34  ;;  %vm695_vm13 = vcmp.eq.f32.partialorder %v3671_v27, %v2952_v31 }
 0x2fe   : > { %v696_v61 = vsel %vm695_vm13, %v691_v2, inf  ;;  %v1058_v0 = vsel %vm1057_vm12, %v1053_v62, inf  ;;  %v3674_v2 = vld [vmem:[#allocation7_spill] sm:$0xff] }
 0x2ff   : > { %697 = vmin.xlane.f32.xlu1 %v696_v61  ;;  %1059 = vmin.xlane.f32.xlu0 %v1058_v0  ;;  %v661_v62 = vand.u32 65535, %v3674_v2  ;;  %v1515_v61 = vcvt.s32.f32 %v1513_v41  ;;  %v1065_v0 = vand.u32 65535, %v3676_v26  ;;  %v1555_v41 = vand.u32 65535, %v2650_v63 }
 0x300   : > { %v2961_v7 = vpop.xlane.xlu0 %1097  ;;  %v2963_v3 = vpop.xlane.xlu1 %1475  ;;  %v731_v26 = vand.u32 65535, %v2647_v19  ;;  %v1107_v19 = vand.u32 65535, %v2675_v10  ;;  %v3684_v10 = vld [vmem:[#allocation17_spill] sm:$0xff] }
 0x301   : > { %3672 = vst [vmem:[#allocation3_spill] sm:$0xff] %v2963_v3  ;;  %vm1477_vm14 = vcmp.eq.f32.partialorder %v2610_v5, %v2963_v3  ;;  %vm1099_vm15 = vcmp.eq.f32.partialorder %v3673_v15, %v2961_v7  ;;  %v1135_v5 = vand.u32 65535, %v2635_v9  ;;  %v3677_v15 = vld [vmem:[#allocation10_spill] sm:$0xff]  ;;  %v3678_v9 = vld [vmem:[#allocation11_spill] sm:$0xff] }
 0x302   : > { %v1100_v20 = vsel %vm1099_vm15, %v1095_v22, inf  ;;  %v1478_v4 = vsel %vm1477_vm14, %v1473_v33, inf  ;;  %v663_v22 = vcvt.s32.f32 %v661_v62  ;;  %v3679_v62 = vld [vmem:[#allocation12_spill] sm:$0xff] }
 0x303   : > { %1101 = vmin.xlane.f32.xlu1 %v1100_v20  ;;  %1479 = vmin.xlane.f32.xlu0 %v1478_v4  ;;  %v1485_v20 = vand.u32 65535, %v3677_v15  ;;  %v1557_v15 = vcvt.s32.f32 %v1555_v41  ;;  %v3683_v41 = vld [vmem:[#allocation16_spill] sm:$0xff] }
 0x304   : > { %v2971_v27 = vpop.xlane.xlu0 %1517 }
 0x305   : > { %vm1519_vm0 = vcmp.eq.f32.partialorder %v3675_v8, %v2971_v27  ;;  %v1137_v8 = vcvt.s32.f32 %v1135_v5  ;;  %v3681_v5 = vld [vmem:[#allocation14_spill] sm:$0xff] }
 0x306   : > { %v1520_v40 = vsel %vm1519_vm0, %v1515_v61, inf  ;;  %v1067_v61 = vcvt.s32.f32 %v1065_v0  ;;  %v3680_v0 = vld [vmem:[#allocation13_spill] sm:$0xff] }
 0x307   : > { %1521 = vmin.xlane.f32.xlu1 %v1520_v40 }
 0x308   : > { %v2977_v3 = vpop.xlane.xlu0 %665 }
 0x309   : > { %vm667_vm1 = vcmp.eq.f32.partialorder %v2628_v14, %v2977_v3 }
 0x30a   : > { %v668_v33 = vsel %vm667_vm1, %v663_v22, inf }
 0x30b   : > { %669 = vmin.xlane.f32.xlu1 %v668_v33  ;;  %v1487_v33 = vcvt.s32.f32 %v1485_v20 }
 0x30c   : > { %v2983_v4 = vpop.xlane.xlu0 %1069  ;;  %v2985_v2 = vpop.xlane.xlu1 %1139 }
 0x30d   : > { %vm1071_vm2 = vcmp.eq.f32.partialorder %v3678_v9, %v2983_v4  ;;  %vm1141_vm3 = vcmp.eq.f32.partialorder %v3679_v62, %v2985_v2 }
 0x30e   : > { %v1072_v40 = vsel %vm1071_vm2, %v1067_v61, inf  ;;  %v1142_v14 = vsel %vm1141_vm3, %v1137_v8, inf  ;;  %v3682_v61 = vld [vmem:[#allocation15_spill] sm:$0xff] }
 0x30f   : > { %1073 = vmin.xlane.f32.xlu1 %v1072_v40  ;;  %1143 = vmin.xlane.f32.xlu0 %v1142_v14  ;;  %v703_v8 = vand.u32 65535, %v3682_v61  ;;  %v733_v14 = vcvt.s32.f32 %v731_v26  ;;  %v3685_v61 = vld [vmem:[#allocation18_spill] sm:$0xff] }
 0x310   : > { %v2992_v22 = vpop.xlane.xlu0 %1489  ;;  %v2994_v63 = vpop.xlane.xlu1 %1559 }
 0x311   : > { %vm1491_vm4 = vcmp.eq.f32.partialorder %v3680_v0, %v2992_v22  ;;  %vm1561_vm5 = vcmp.eq.f32.partialorder %v3681_v5, %v2994_v63  ;;  %v745_v0 = vand.u32 65535, %v3683_v41  ;;  %v1527_v5 = vand.u32 65535, %v2690_v12 }
 0x312   : > { %v1492_v9 = vsel %vm1491_vm4, %v1487_v33, inf  ;;  %v1562_v62 = vsel %vm1561_vm5, %v1557_v15, inf  ;;  %v787_v12 = vand.u32 65535, %v2706_v45  ;;  %v1191_v45 = vand.u32 65535, %v2722_v47 }
 0x313   : > { %1493 = vmin.xlane.f32.xlu1 %v1492_v9  ;;  %1563 = vmin.xlane.f32.xlu0 %v1562_v62  ;;  %v705_v9 = vcvt.s32.f32 %v703_v8  ;;  %v1109_v62 = vcvt.s32.f32 %v1107_v19  ;;  %v747_v8 = vcvt.s32.f32 %v745_v0  ;;  %v1529_v19 = vcvt.s32.f32 %v1527_v5 }
 0x314   : > { %v3002_v40 = vpop.xlane.xlu0 %735  ;;  %v789_v5 = vcvt.s32.f32 %v787_v12  ;;  %v1611_v47 = vand.u32 65535, %v2738_v49  ;;  %v1193_v12 = vcvt.s32.f32 %v1191_v45  ;;  %v759_v49 = vand.u32 65535, %v2754_v51 }
 0x315   : > { %vm737_vm6 = vcmp.eq.f32.partialorder %v2668_v46, %v3002_v40  ;;  %v1163_v51 = vand.u32 65535, %v2770_v53  ;;  %v1583_v53 = vand.u32 65535, %v2786_v55  ;;  %v843_v55 = vand.u32 65535, %v2802_v59 }
 0x316   : > { %v738_v20 = vsel %vm737_vm6, %v733_v14, inf  ;;  %v1149_v14 = vand.u32 65535, %v3685_v61  ;;  %v1613_v45 = vcvt.s32.f32 %v1611_v47  ;;  %v761_v47 = vcvt.s32.f32 %v759_v49 }
 0x317   : > { %739 = vmin.xlane.f32.xlu1 %v738_v20  ;;  %v1165_v49 = vcvt.s32.f32 %v1163_v51  ;;  %v1585_v51 = vcvt.s32.f32 %v1583_v53  ;;  %v1247_v59 = vand.u32 65535, %v2818_v60  ;;  %v845_v53 = vcvt.s32.f32 %v843_v55 }
 0x318   : > { %v3008_v33 = vpop.xlane.xlu0 %707  ;;  %v3010_v15 = vpop.xlane.xlu1 %1111  ;;  %v1151_v0 = vcvt.s32.f32 %v1149_v14  ;;  %v1177_v55 = vand.u32 65535, %v2831_v17 }
 0x319   : > { %vm709_vm7 = vcmp.eq.f32.partialorder %v2681_v48, %v3008_v33  ;;  %vm1113_vm8 = vcmp.eq.f32.partialorder %v3684_v10, %v3010_v15  ;;  %v3686_v48 = vld [vmem:[#allocation19_spill] sm:$0xff]  ;;  %v3687_v10 = vld [vmem:[#allocation20_spill] sm:$0xff] }
 0x31a   : > { %v710_v26 = vsel %vm709_vm7, %v705_v9, inf  ;;  %v1114_v46 = vsel %vm1113_vm8, %v1109_v62, inf  ;;  %v1179_v17 = vcvt.s32.f32 %v1177_v55 }
 0x31b   : > { %711 = vmin.xlane.f32.xlu1 %v710_v26  ;;  %1115 = vmin.xlane.f32.xlu0 %v1114_v46  ;;  %v1569_v26 = vand.u32 65535, %v3687_v10 }
 0x31c   : > { %v3018_v20 = vpop.xlane.xlu0 %749  ;;  %v3020_v41 = vpop.xlane.xlu1 %1531 }
 0x31d   : > { %vm751_vm9 = vcmp.eq.f32.partialorder %v2697_v11, %v3018_v20  ;;  %vm1533_vm10 = vcmp.eq.f32.partialorder %v3686_v48, %v3020_v41  ;;  %v3688_v11 = vld [vmem:[#allocation21_spill] sm:$0xff]  ;;  %v3689_v48 = vld [vmem:[#allocation22_spill] sm:$0xff]  ;;  %v1571_v14 = vcvt.s32.f32 %v1569_v26 }
 0x31e   : > { %v752_v9 = vsel %vm751_vm9, %v747_v8, inf  ;;  %v1534_v62 = vsel %vm1533_vm10, %v1529_v19, inf }
 0x31f   : > { %753 = vmin.xlane.f32.xlu1 %v752_v9  ;;  %1535 = vmin.xlane.f32.xlu0 %v1534_v62  ;;  %v717_v9 = vand.u32 65535, %v3689_v48 }
 0x320   : > { %v3028_v46 = vpop.xlane.xlu0 %1153  ;;  %v3030_v61 = vpop.xlane.xlu1 %791 }
 0x321   : > { %vm1155_vm11 = vcmp.eq.f32.partialorder %v2713_v43, %v3028_v46  ;;  %vm793_vm12 = vcmp.eq.f32.partialorder %v3688_v11, %v3030_v61  ;;  %v3690_v43 = vld [vmem:[#allocation23_spill] sm:$0xff]  ;;  %v3691_v11 = vld [vmem:[#allocation24_spill] sm:$0xff]  ;;  %v719_v26 = vcvt.s32.f32 %v717_v9 }
 0x322   : > { %v1156_v8 = vsel %vm1155_vm11, %v1151_v0, inf  ;;  %v794_v19 = vsel %vm793_vm12, %v789_v5, inf }
 0x323   : > { %1157 = vmin.xlane.f32.xlu1 %v1156_v8  ;;  %795 = vmin.xlane.f32.xlu0 %v794_v19  ;;  %v1121_v8 = vand.u32 65535, %v3691_v11 }
 0x324   : > { %v3038_v62 = vpop.xlane.xlu0 %1573  ;;  %v3040_v10 = vpop.xlane.xlu1 %1195 }
 0x325   : > { %vm1575_vm13 = vcmp.eq.f32.partialorder %v2729_v52, %v3038_v62  ;;  %vm1197_vm14 = vcmp.eq.f32.partialorder %v3690_v43, %v3040_v10  ;;  %v3692_v52 = vld [vmem:[#allocation25_spill] sm:$0xff]  ;;  %v3693_v43 = vld [vmem:[#allocation26_spill] sm:$0xff]  ;;  %v1123_v9 = vcvt.s32.f32 %v1121_v8 }
 0x326   : > { %v1576_v0 = vsel %vm1575_vm13, %v1571_v14, inf  ;;  %v1198_v5 = vsel %vm1197_vm14, %v1193_v12, inf }
 0x327   : > { %1577 = vmin.xlane.f32.xlu1 %v1576_v0  ;;  %1199 = vmin.xlane.f32.xlu0 %v1198_v5  ;;  %v1541_v0 = vand.u32 65535, %v3693_v43 }
 0x328   : > { %v3048_v19 = vpop.xlane.xlu0 %721  ;;  %v3050_v48 = vpop.xlane.xlu1 %1615 }
 0x329   : > { %vm723_vm15 = vcmp.eq.f32.partialorder %v2745_v54, %v3048_v19  ;;  %vm1617_vm0 = vcmp.eq.f32.partialorder %v3692_v52, %v3050_v48  ;;  %v1543_v8 = vcvt.s32.f32 %v1541_v0 }
 0x32a   : > { %v724_v14 = vsel %vm723_vm15, %v719_v26, inf  ;;  %v1618_v12 = vsel %vm1617_vm0, %v1613_v45, inf  ;;  %v3694_v45 = vld [vmem:[#allocation27_spill] sm:$0xff] }
 0x32b   : > { %725 = vmin.xlane.f32.xlu1 %v724_v14  ;;  %1619 = vmin.xlane.f32.xlu0 %v1618_v12  ;;  %v801_v52 = vand.u32 65535, %v3694_v45 }
 0x32c   : > { %v3058_v5 = vpop.xlane.xlu0 %1125  ;;  %v3060_v11 = vpop.xlane.xlu1 %763 }
 0x32d   : > { %vm1127_vm1 = vcmp.eq.f32.partialorder %v2761_v56, %v3058_v5  ;;  %vm765_vm2 = vcmp.eq.f32.partialorder %v2763_v6, %v3060_v11  ;;  %v3695_v56 = vld [vmem:[#allocation28_spill] sm:$0xff]  ;;  %v803_v0 = vcvt.s32.f32 %v801_v52 }
 0x32e   : > { %v1128_v54 = vsel %vm1127_vm1, %v1123_v9, inf  ;;  %v766_v26 = vsel %vm765_vm2, %v761_v47, inf  ;;  %v3696_v9 = vld [vmem:[#allocation29_spill] sm:$0xff] }
 0x32f   : > { %1129 = vmin.xlane.f32.xlu1 %v1128_v54  ;;  %767 = vmin.xlane.f32.xlu0 %v766_v26  ;;  %v1205_v47 = vand.u32 65535, %v3696_v9 }
 0x330   : > { %v3068_v14 = vpop.xlane.xlu0 %1545  ;;  %v3070_v12 = vpop.xlane.xlu1 %1167 }
 0x331   : > { %vm1547_vm3 = vcmp.eq.f32.partialorder %v2777_v58, %v3068_v14  ;;  %vm1169_vm4 = vcmp.eq.f32.partialorder %v3695_v56, %v3070_v12  ;;  %v3697_v58 = vld [vmem:[#allocation30_spill] sm:$0xff]  ;;  %v1207_v52 = vcvt.s32.f32 %v1205_v47 }
 0x332   : > { %v1548_v6 = vsel %vm1547_vm3, %v1543_v8, inf  ;;  %v1170_v43 = vsel %vm1169_vm4, %v1165_v49, inf  ;;  %v3698_v49 = vld [vmem:[#allocation31_spill] sm:$0xff] }
 0x333   : > { %1549 = vmin.xlane.f32.xlu1 %v1548_v6  ;;  %1171 = vmin.xlane.f32.xlu0 %v1170_v43  ;;  %v1625_v56 = vand.u32 65535, %v3698_v49  ;;  %v1249_v49 = vcvt.s32.f32 %v1247_v59  ;;  %v3701_v59 = vld [vmem:[#allocation36_spill] sm:$0xff] }
 0x334   : > { %v3078_v54 = vpop.xlane.xlu0 %805  ;;  %v3080_v26 = vpop.xlane.xlu1 %1587 }
 0x335   : > { %vm807_vm5 = vcmp.eq.f32.partialorder %v2793_v38, %v3078_v54  ;;  %vm1589_vm6 = vcmp.eq.f32.partialorder %v3697_v58, %v3080_v26  ;;  %v3699_v38 = vld [vmem:[#allocation32_spill] sm:$0xff] }
 0x336   : > { %v808_v45 = vsel %vm807_vm5, %v803_v0, inf  ;;  %v1590_v8 = vsel %vm1589_vm6, %v1585_v51, inf  ;;  %v3700_v51 = vld [vmem:[#allocation33_spill] sm:$0xff] }
 0x337   : > { %809 = vmin.xlane.f32.xlu1 %v808_v45  ;;  %1591 = vmin.xlane.f32.xlu0 %v1590_v8  ;;  %v773_v58 = vand.u32 65535, %v3700_v51  ;;  %v1627_v8 = vcvt.s32.f32 %v1625_v56 }
 0x338   : > { %v3088_v6 = vpop.xlane.xlu0 %1209  ;;  %v3090_v43 = vpop.xlane.xlu1 %847 }
 0x339   : > { %vm1211_vm7 = vcmp.eq.f32.partialorder %v2809_v18, %v3088_v6  ;;  %vm849_vm8 = vcmp.eq.f32.partialorder %v3699_v38, %v3090_v43  ;;  %v775_v56 = vcvt.s32.f32 %v773_v58 }
 0x33a   : > { %v1212_v9 = vsel %vm1211_vm7, %v1207_v52, inf  ;;  %v850_v0 = vsel %vm849_vm8, %v845_v53, inf  ;;  %v815_v52 = vand.u32 65535, %v2850_v21 }
 0x33b   : > { %1213 = vmin.xlane.f32.xlu1 %v1212_v9  ;;  %851 = vmin.xlane.f32.xlu0 %v850_v0  ;;  %v1219_v9 = vand.u32 65535, %v2866_v35  ;;  %v1639_v35 = vand.u32 65535, %v2882_v36 }
 0x33c   : > { %v3097_v45 = vpop.xlane.xlu0 %1629  ;;  %v3099_v60 = vpop.xlane.xlu1 %1251  ;;  %v817_v21 = vcvt.s32.f32 %v815_v52 }
 0x33d   : > { %vm1631_vm9 = vcmp.eq.f32.partialorder %v2825_v28, %v3097_v45  ;;  %vm1253_vm10 = vcmp.eq.f32.partialorder %v2827_v50, %v3099_v60  ;;  %v1597_v50 = vand.u32 65535, %v3701_v59  ;;  %v1221_v52 = vcvt.s32.f32 %v1219_v9 }
 0x33e   : > { %v1632_v18 = vsel %vm1631_vm9, %v1627_v8, inf  ;;  %v1254_v47 = vsel %vm1253_vm10, %v1249_v49, inf  ;;  %v3702_v8 = vld [vmem:[#allocation37_spill] sm:$0xff] }
 0x33f   : > { %1633 = vmin.xlane.f32.xlu1 %v1632_v18  ;;  %1255 = vmin.xlane.f32.xlu0 %v1254_v47  ;;  %v857_v49 = vand.u32 65535, %v3702_v8  ;;  %v1599_v55 = vcvt.s32.f32 %v1597_v50  ;;  %v3706_v8 = vld [vmem:[#allocation35_spill] sm:$0xff] }
 0x340   : > { %v3107_v53 = vpop.xlane.xlu0 %777  ;;  %v3109_v38 = vpop.xlane.xlu1 %1671 }
 0x341   : > { %vm779_vm11 = vcmp.eq.f32.partialorder %v2841_v24, %v3107_v53  ;;  %v859_v50 = vcvt.s32.f32 %v857_v49  ;;  %vm1673_vm2 = vcmp.eq.f32.partialorder %v3706_v8, %v3109_v38 }
 0x342   : > { %v780_v28 = vsel %vm779_vm11, %v775_v56, inf }
 0x343   : > { %781 = vmin.xlane.f32.xlu1 %v780_v28  ;;  %v3704_v28 = vld [vmem:[#allocation39_spill] sm:$0xff] }
 0x344   : > { %v3115_v0 = vpop.xlane.xlu0 %1181  ;;  %v3117_v51 = vpop.xlane.xlu1 %819  ;;  %v1261_v59 = vand.u32 65535, %v3704_v28 }
 0x345   : > { %vm1183_vm12 = vcmp.eq.f32.partialorder %v2857_v13, %v3115_v0  ;;  %vm821_vm13 = vcmp.eq.f32.partialorder %v2859_v30, %v3117_v51  ;;  %v3703_v13 = vld [vmem:[#allocation38_spill] sm:$0xff] }
 0x346   : > { %v1184_v58 = vsel %vm1183_vm12, %v1179_v17, inf  ;;  %v822_v24 = vsel %vm821_vm13, %v817_v21, inf  ;;  %v3705_v17 = vld [vmem:[#allocation34_spill] sm:$0xff]  ;;  %v1641_v21 = vcvt.s32.f32 %v1639_v35  ;;  %v1263_v35 = vcvt.s32.f32 %v1261_v59 }
 0x347   : > { %1185 = vmin.xlane.f32.xlu1 %v1184_v58  ;;  %823 = vmin.xlane.f32.xlu0 %v822_v24  ;;  %v1667_v36 = vand.u32 65535, %v3705_v17  ;;  %v3707_v17 = vld [vmem:[#allocation42_spill] sm:$0xff] }
 0x348   : > { %v3125_v18 = vpop.xlane.xlu0 %1601  ;;  %v3127_v47 = vpop.xlane.xlu1 %1223 }
 0x349   : > { %vm1603_vm14 = vcmp.eq.f32.partialorder %v2873_v32, %v3125_v18  ;;  %vm1225_vm15 = vcmp.eq.f32.partialorder %v3703_v13, %v3127_v47 }
 0x34a   : > { %v1604_v30 = vsel %vm1603_vm14, %v1599_v55, inf  ;;  %v1226_v56 = vsel %vm1225_vm15, %v1221_v52, inf  ;;  %v1669_v52 = vcvt.s32.f32 %v1667_v36  ;;  %v3708_v36 = vld [vmem:[#allocation43_spill] sm:$0xff] }
 0x34b   : > { %1605 = vmin.xlane.f32.xlu1 %v1604_v30  ;;  %1227 = vmin.xlane.f32.xlu0 %v1226_v56  ;;  %v1233_v30 = vand.u32 65535, %v2911_v39 }
 0x34c   : > { %v3135_v58 = vpop.xlane.xlu0 %861  ;;  %v3137_v24 = vpop.xlane.xlu1 %1643  ;;  %v1674_v13 = vsel %vm1673_vm2, %v1669_v52, inf  ;;  %v3710_v52 = vld [vmem:[#allocation41_spill] sm:$0xff] }
 0x34d   : > { %vm863_vm0 = vcmp.eq.f32.partialorder %v2888_v42, %v3135_v58  ;;  %vm1645_vm1 = vcmp.eq.f32.partialorder %v2890_v44, %v3137_v24  ;;  %v829_v42 = vand.u32 65535, %v2903_v29 }
 0x34e   : > { %v864_v32 = vsel %vm863_vm0, %v859_v50, inf  ;;  %v1646_v9 = vsel %vm1645_vm1, %v1641_v21, inf  ;;  %v1235_v50 = vcvt.s32.f32 %v1233_v30 }
 0x34f   : > { %865 = vmin.xlane.f32.xlu1 %v864_v32  ;;  %1647 = vmin.xlane.f32.xlu0 %v1646_v9  ;;  %v831_v28 = vcvt.s32.f32 %v829_v42  ;;  %v3709_v32 = vld [vmem:[#allocation40_spill] sm:$0xff] }
 0x350   : > { %v3145_v55 = vpop.xlane.xlu0 %1265  ;;  %v1681_v39 = vand.u32 65535, %v3709_v32  ;;  %v3711_v42 = vld [vmem:[#allocation44_spill] sm:$0xff] }
 0x351   : > { %vm1267_vm3 = vcmp.eq.f32.partialorder %v2899_v37, %v3145_v55  ;;  %v1653_v37 = vand.u32 65535, %v3708_v36  ;;  %v1090_v30 = vcvt.f32.s32 %v3711_v42  ;;  %v1104_v36 = vcvt.f32.s32 %v2961_v7 }
 0x352   : > { %v1268_v49 = vsel %vm1267_vm3, %v1263_v35, inf }
 0x353   : > { %1269 = vmin.xlane.f32.xlu1 %v1268_v49  ;;  %1675 = vmin.xlane.f32.xlu0 %v1674_v13  ;;  %v1655_v9 = vcvt.s32.f32 %v1653_v37  ;;  %v1683_v49 = vcvt.s32.f32 %v1681_v39  ;;  %v1091_v32 = vshll.u32 %v1090_v30, 16  ;;  %v3187_v7 = vshll.u32 %v1104_v36, 16  ;;  %v3713_v30 = vld [vmem:[#allocation2_spill] sm:$0xff] }
 0x354   : > { %v3150_v44 = vpop.xlane.xlu0 %1685  ;;  %vm919_vm8 = vcmp.eq.s32.totalorder %v3713_v30, 83  ;;  %vm1323_vm9 = vcmp.eq.s32.totalorder %v3713_v30, 84  ;;  %vm1743_vm10 = vcmp.eq.s32.totalorder %v3713_v30, 85 }
 0x355   : > { %vm1687_vm7 = vcmp.eq.f32.partialorder %v3710_v52, %v3150_v44  ;;  %v1496_v52 = vcvt.f32.s32 %v2992_v22 }
 0x356   : > { %v1688_v13 = vsel %vm1687_vm7, %v1683_v49, inf  ;;  %v1566_v49 = vcvt.f32.s32 %v2994_v63 }
 0x358   : > { %v3153_v56 = vpop.xlane.xlu0 %833 }
 0x359   : > { %vm835_vm4 = vcmp.eq.f32.partialorder %v3707_v17, %v3153_v56  ;;  %v658_v17 = vcvt.f32.s32 %v2946_v16  ;;  %v1076_v16 = vcvt.f32.s32 %v2983_v4  ;;  %v756_v4 = vcvt.f32.s32 %v3018_v20 }
 0x35a   : > { %v836_v59 = vsel %vm835_vm4, %v831_v28, inf  ;;  %v1510_v28 = vcvt.f32.s32 %v2940_v1  ;;  %v672_v1 = vcvt.f32.s32 %v2977_v3  ;;  %v1118_v3 = vcvt.f32.s32 %v3010_v15 }
 0x35b   : > { %837 = vmin.xlane.f32.xlu1 %v836_v59  ;;  %v700_v59 = vcvt.f32.s32 %v2952_v31  ;;  %v1146_v31 = vcvt.f32.s32 %v2985_v2  ;;  %v1538_v2 = vcvt.f32.s32 %v3020_v41  ;;  %v3203_v22 = vshll.u32 %v1076_v16, 16 }
 0x35c   : > { %v3158_v21 = vpop.xlane.xlu0 %1237  ;;  %v1511_v39 = vshll.u32 %v1510_v28, 16  ;;  %v3201_v28 = vshll.u32 %v672_v1, 16 }
 0x35d   : > { %vm1239_vm5 = vcmp.eq.f32.partialorder %v2923_v25, %v3158_v21  ;;  %v686_v25 = vcvt.f32.s32 %v2932_v57  ;;  %v1524_v57 = vcvt.f32.s32 %v2971_v27  ;;  %v742_v27 = vcvt.f32.s32 %v3002_v40 }
 0x35e   : > { %v1240_v29 = vsel %vm1239_vm5, %v1235_v50, inf  ;;  %v3712_v50 = vld [vmem:[#allocation3_spill] sm:$0xff]  ;;  %v3205_v63 = vshll.u32 %v1146_v31, 16  ;;  %v1160_v40 = vcvt.f32.s32 %v3028_v46  ;;  %v3222_v46 = vshll.u32 %v1538_v2, 16 }
 0x35f   : > { %1241 = vmin.xlane.f32.xlu1 %v1240_v29  ;;  %v687_v37 = vshll.u32 %v686_v25, 16  ;;  %v1482_v29 = vcvt.f32.s32 %v3712_v50  ;;  %v714_v25 = vcvt.f32.s32 %v3008_v33  ;;  %v3196_v42 = vshll.u32 %v1524_v57, 16 }
 0x360   : > { %v3163_v8 = vpop.xlane.xlu0 %1657  ;;  %v3217_v50 = vshll.u32 %v1118_v3, 16  ;;  %v3220_v57 = vshll.u32 %v756_v4, 16  ;;  %v3224_v31 = vshll.u32 %v1160_v40, 16  ;;  %v1622_v3 = vcvt.f32.s32 %v3050_v48 }
 0x361   : > { %vm1659_vm6 = vcmp.eq.f32.partialorder %v2926_v23, %v3163_v8  ;;  %v1062_v23 = vcvt.f32.s32 %v2954_v34  ;;  %v3215_v36 = vshll.u32 %v714_v25, 16 }
 0x362   : > { %v1660_v35 = vsel %vm1659_vm6, %v1655_v9, inf  ;;  %v3177_v9 = vshll.u32 %v658_v17, 16  ;;  %v3209_v17 = vshll.u32 %v1496_v52, 16  ;;  %v1580_v52 = vcvt.f32.s32 %v3038_v62 }
 0x363   : > { %1661 = vmin.xlane.f32.xlu1 %v1660_v35  ;;  %v3180_v35 = vshll.u32 %v700_v59, 16  ;;  %v3185_v34 = vshll.u32 %v1062_v23, 16  ;;  %v3211_v59 = vshll.u32 %v1566_v49, 16  ;;  %v3213_v23 = vshll.u32 %v742_v27, 16 }
 0x364   : > { %v1202_v49 = vcvt.f32.s32 %v3040_v10  ;;  %v728_v27 = vcvt.f32.s32 %v3048_v19  ;;  %v1132_v10 = vcvt.f32.s32 %v3058_v5  ;;  %v770_v19 = vcvt.f32.s32 %v3060_v11 }
 0x365   : > { %v1552_v11 = vcvt.f32.s32 %v3068_v14 }
 0x367   : > { %1689 = vmin.xlane.f32.xlu1 %v1688_v13  ;;  %v3191_v13 = vshll.u32 %v1482_v29, 16  ;;  %v798_v29 = vcvt.f32.s32 %v3030_v61 }
 0x369   : > { %v3232_v2 = vshll.u32 %v798_v29, 16 }
 0x380   : > { %v1088_v33 = vpop.xlane.xlu0 %1087  ;;  %v684_v15 = vpop.xlane.xlu1 %683 }
 0x381   : > { %v1089_v20 = vcvt.f32.s32 %v1088_v33  ;;  %v685_v41 = vcvt.f32.s32 %v684_v15  ;;  %v3240_v33 = vshll.u32 %v1580_v52, 16  ;;  %v3242_v15 = vshll.u32 %v1202_v49, 16 }
 0x382   : > { %v3251_v52 = vshll.u32 %v1132_v10, 16  ;;  %v3253_v49 = vshll.u32 %v770_v19, 16  ;;  %v3261_v19 = vshll.u32 %v1552_v11, 16  ;;  %v1594_v11 = vcvt.f32.s32 %v3080_v26 }
 0x383   : > { %v1092_v1 = vadd.s32 %v1091_v32, %v1089_v20  ;;  %v688_v16 = vadd.s32 %v687_v37, %v685_v41  ;;  %v2203_v37 = vmov 0.0  }
 0x384   : > { %v1508_v25 = vpop.xlane.xlu0 %1507 }
 0x385   : > { %v1987_v61 = vadd.s32 4294967287, %v1092_v1  ;;  %vm873_vm11 = vcmp.eq.s32.totalorder %v3713_v30, %v688_v16  ;;  %v922_v4 = vcvt.s32.f32 %v688_v16  ;;  %vm1277_vm12 = vcmp.eq.s32.totalorder %v3713_v30, %v1092_v1 }
 0x386   : > { %v889_v62 = vsel %vm873_vm11, 1.0, %v2203_v37  ;;  %v1509_v32 = vcvt.f32.s32 %v1508_v25  ;;  %v3244_v1 = vshll.u32 %v728_v27, 16  ;;  %v3246_v16 = vshll.u32 %v1622_v3, 16 }
 0x387   : > { %v1342_v40 = vcvt.s32.f32 %v1987_v61  ;;  %v938_v48 = vsel %vm919_vm8, %v922_v4, 0.0  ;;  %v1293_v25 = vsel %vm1277_vm12, 1.0, %v2203_v37  ;;  %v1174_v3 = vcvt.f32.s32 %v3070_v12 }
 0x388   : > { %v954_v20 = vadd.f32 %v938_v48, %v889_v62  ;;  %v1512_v41 = vadd.s32 %v1511_v39, %v1509_v32  ;;  %v656_v29 = vpop.xlane.xlu1 %655 }
 0x389   : > { %v657_v5 = vcvt.f32.s32 %v656_v29  ;;  %v1358_v39 = vsel %vm1323_vm9, %v1342_v40, 0.0 }
 0x38a   : > { %v1309_v61 = vadd.f32 %v1293_v25, %v954_v20  ;;  %vm1697_vm13 = vcmp.eq.s32.totalorder %v3713_v30, %v1512_v41  ;;  %v2003_v4 = vadd.s32 4294967262, %v1512_v41  ;;  %v812_v25 = vcvt.f32.s32 %v3078_v54 }
 0x38b   : > { %v660_v27 = vadd.s32 %v3177_v9, %v657_v5  ;;  %v1713_v32 = vsel %vm1697_vm13, 1.0, %v2203_v37 }
 0x38c   : > { %v1374_v62 = vadd.f32 %v1358_v39, %v1309_v61  ;;  %v1762_v48 = vcvt.s32.f32 %v2003_v4  ;;  %v1060_v14 = vpop.xlane.xlu0 %1059  ;;  %v698_v20 = vpop.xlane.xlu1 %697  ;;  %v3271_v39 = vshll.u32 %v1174_v3, 16 }
 0x38d   : > { %vm871_vm14 = vcmp.eq.s32.totalorder %v3713_v30, %v660_v27  ;;  %v920_v41 = vcvt.s32.f32 %v660_v27  ;;  %v1061_v10 = vcvt.f32.s32 %v1060_v14  ;;  %v699_v29 = vcvt.f32.s32 %v698_v20 }
 0x38e   : > { %v1729_v40 = vadd.f32 %v1713_v32, %v1374_v62  ;;  %v887_v9 = vsel %vm871_vm14, 1.0, %v2203_v37  ;;  %v1778_v12 = vsel %vm1743_vm10, %v1762_v48, 0.0 }
 0x38f   : > { %v936_v5 = vsel %vm919_vm8, %v920_v41, 0.0  ;;  %v1064_v61 = vadd.s32 %v3185_v34, %v1061_v10  ;;  %v702_v4 = vadd.s32 %v3180_v35, %v699_v29  ;;  %v3280_v41 = vshll.u32 %v812_v25, 16 }
 0x390   : > { %v3274_v27 = vadd.f32 %v1778_v12, %v1729_v40  ;;  %v952_v54 = vadd.f32 %v936_v5, %v887_v9  ;;  %v1480_v62 = vpop.xlane.xlu0 %1479  ;;  %v1102_v32 = vpop.xlane.xlu1 %1101  ;;  %v1216_v40 = vcvt.f32.s32 %v3088_v6 }
 0x391   : > { %vm1275_vm15 = vcmp.eq.s32.totalorder %v3713_v30, %v1064_v61  ;;  %v1985_v14 = vadd.s32 4294967287, %v1064_v61  ;;  %vm874_vm0 = vcmp.eq.s32.totalorder %v3713_v30, %v702_v4  ;;  %v923_v48 = vcvt.s32.f32 %v702_v4 }
 0x392   : > { %v1291_v20 = vsel %vm1275_vm15, 1.0, %v2203_v37  ;;  %v890_v34 = vsel %vm874_vm0, 1.0, %v2203_v37  ;;  %v1481_v35 = vcvt.f32.s32 %v1480_v62  ;;  %v1103_v3 = vcvt.f32.s32 %v1102_v32 }
 0x393   : > { %v1307_v26 = vadd.f32 %v1291_v20, %v952_v54  ;;  %v1340_v10 = vcvt.s32.f32 %v1985_v14  ;;  %v939_v29 = vsel %vm919_vm8, %v923_v48, 0.0  ;;  %v854_v4 = vcvt.f32.s32 %v3090_v43 }
 0x394   : > { %v955_v9 = vadd.f32 %v939_v29, %v890_v34  ;;  %v1484_v12 = vadd.s32 %v3191_v13, %v1481_v35  ;;  %v1106_v5 = vadd.s32 %v3187_v7, %v1103_v3  ;;  %v1522_v61 = vpop.xlane.xlu1 %1521  ;;  %v1636_v62 = vcvt.f32.s32 %v3097_v45 }
 0x395   : > { %v1356_v25 = vsel %vm1323_vm9, %v1340_v10, 0.0  ;;  %v1523_v54 = vcvt.f32.s32 %v1522_v61  ;;  %v1258_v43 = vcvt.f32.s32 %v3099_v60  ;;  %v784_v29 = vcvt.f32.s32 %v3107_v53 }
 0x396   : > { %v1372_v32 = vadd.f32 %v1356_v25, %v1307_v26  ;;  %vm1695_vm1 = vcmp.eq.s32.totalorder %v3713_v30, %v1484_v12  ;;  %v2001_v14 = vadd.s32 4294967262, %v1484_v12  ;;  %vm1278_vm2 = vcmp.eq.s32.totalorder %v3713_v30, %v1106_v5 }
 0x397   : > { %v1711_v6 = vsel %vm1695_vm1, 1.0, %v2203_v37  ;;  %v1294_v13 = vsel %vm1278_vm2, 1.0, %v2203_v37  ;;  %v1988_v7 = vadd.s32 4294967287, %v1106_v5  ;;  %v1526_v48 = vadd.s32 %v3196_v42, %v1523_v54 }
 0x398   : > { %v1727_v45 = vadd.f32 %v1711_v6, %v1372_v32  ;;  %v1760_v20 = vcvt.s32.f32 %v2001_v14  ;;  %v1310_v34 = vadd.f32 %v1294_v13, %v955_v9  ;;  %v670_v35 = vpop.xlane.xlu1 %669  ;;  %v1678_v12 = vcvt.f32.s32 %v3109_v38 }
 0x399   : > { %v1343_v3 = vcvt.s32.f32 %v1988_v7  ;;  %vm1698_vm3 = vcmp.eq.s32.totalorder %v3713_v30, %v1526_v48  ;;  %v2004_v26 = vadd.s32 4294967262, %v1526_v48  ;;  %v671_v10 = vcvt.f32.s32 %v670_v35 }
 0x39a   : > { %v1776_v5 = vsel %vm1743_vm10, %v1760_v20, 0.0  ;;  %v1714_v42 = vsel %vm1698_vm3, 1.0, %v2203_v37  ;;  %v3308_v54 = vshll.u32 %v1594_v11, 16  ;;  %v3310_v32 = vshll.u32 %v1216_v40, 16 }
 0x39b   : > { %v3303_v61 = vadd.f32 %v1776_v5, %v1727_v45  ;;  %v1359_v60 = vsel %vm1323_vm9, %v1343_v3, 0.0  ;;  %v1763_v9 = vcvt.s32.f32 %v2004_v26  ;;  %v674_v25 = vadd.s32 %v3201_v28, %v671_v10 }
 0x39c   : > { %v3312_v53 = vshll.u32 %v854_v4, 16  ;;  %v1375_v38 = vadd.f32 %v1359_v60, %v1310_v34  ;;  %v1144_v14 = vpop.xlane.xlu0 %1143  ;;  %v1074_v6 = vpop.xlane.xlu1 %1073  ;;  %v3317_v45 = vshll.u32 %v1636_v62, 16  ;;  %v3320_v20 = vshll.u32 %v1258_v43, 16 }
 0x39d   : > { %v1779_v13 = vsel %vm1743_vm10, %v1763_v9, 0.0  ;;  %vm872_vm4 = vcmp.eq.s32.totalorder %v3713_v30, %v674_v25  ;;  %v921_v7 = vcvt.s32.f32 %v674_v25  ;;  %v1145_v48 = vcvt.f32.s32 %v1144_v14 }
 0x39e   : > { %v1730_v28 = vadd.f32 %v1714_v42, %v1375_v38  ;;  %v888_v11 = vsel %vm872_vm4, 1.0, %v2203_v37  ;;  %v1075_v40 = vcvt.f32.s32 %v1074_v6  ;;  %v3322_v4 = vshll.u32 %v784_v29, 16 }
 0x39f   : > { %v3324_v34 = vshll.u32 %v1678_v12, 16  ;;  %v937_v35 = vsel %vm919_vm8, %v921_v7, 0.0  ;;  %v1148_v10 = vadd.s32 %v3205_v63, %v1145_v48  ;;  %v1188_v60 = vcvt.f32.s32 %v3115_v0 }
 0x3a0   : > { %v1795_v3 = vadd.f32 %v1779_v13, %v1730_v28  ;;  %v953_v26 = vadd.f32 %v937_v35, %v888_v11  ;;  %v1078_v62 = vadd.s32 %v3203_v22, %v1075_v40  ;;  %v1564_v5 = vpop.xlane.xlu0 %1563  ;;  %v1494_v42 = vpop.xlane.xlu1 %1493  ;;  %v826_v43 = vcvt.f32.s32 %v3117_v51 }
 0x3a1   : > { %v1565_v29 = vcvt.f32.s32 %v1564_v5  ;;  %v1495_v12 = vcvt.f32.s32 %v1494_v42  ;;  %v1608_v9 = vcvt.f32.s32 %v3125_v18  ;;  %v1230_v0 = vcvt.f32.s32 %v3127_v47 }
 0x3a2   : > { %v2059_v63 = vpack.c.bf16 %v1795_v3, %v3274_v27  ;;  %vm1276_vm5 = vcmp.eq.s32.totalorder %v3713_v30, %v1078_v62  ;;  %v1986_v22 = vadd.s32 4294967287, %v1078_v62  ;;  %v868_v51 = vcvt.f32.s32 %v3135_v58 }
 0x3a3   : > { %v1292_v25 = vsel %vm1276_vm5, 1.0, %v2203_v37  ;;  %v1498_v38 = vadd.s32 %v3209_v17, %v1495_v12  ;;  %v1991_v14 = vadd.s32 4294967287, %v1148_v10  ;;  %v1568_v7 = vadd.s32 %v3211_v59, %v1565_v29 }
 0x3a4   : > { %2091 = vst [vmem:[%s3337_s10 + $0x8] sm:$0xff] %v2059_v63   ;;  %v1308_v6 = vadd.f32 %v1292_v25, %v953_v26  ;;  %v1341_v13 = vcvt.s32.f32 %v1986_v22  ;;  %v740_v18 = vpop.xlane.xlu1 %739  ;;  %v3348_v48 = vshll.u32 %v1188_v60, 16  ;;  %v3350_v27 = vshll.u32 %v826_v43, 16 }
 0x3a5   : > { %v1650_v28 = vcvt.f32.s32 %v3137_v24  ;;  %vm1696_vm6 = vcmp.eq.s32.totalorder %v3713_v30, %v1498_v38  ;;  %v3354_v47 = vshll.u32 %v1608_v9, 16  ;;  %v2002_v11 = vadd.s32 4294967262, %v1498_v38 }
 0x3a6   : > { %v1357_v58 = vsel %vm1323_vm9, %v1341_v13, 0.0  ;;  %v1712_v17 = vsel %vm1696_vm6, 1.0, %v2203_v37  ;;  %v3359_v40 = vshll.u32 %v1230_v0, 16  ;;  %vm1281_vm7 = vcmp.eq.s32.totalorder %v3713_v30, %v1148_v10 }
 0x3a7   : > { %v1373_v59 = vadd.f32 %v1357_v58, %v1308_v6  ;;  %v741_v35 = vcvt.f32.s32 %v740_v18  ;;  %v3362_v3 = vshll.u32 %v868_v51, 16  ;;  %v1346_v26 = vcvt.s32.f32 %v1991_v14 }
 0x3a8   : > { %v2007_v24 = vadd.s32 4294967262, %v1568_v7  ;;  %v1761_v62 = vcvt.s32.f32 %v2002_v11  ;;  %v1116_v5 = vpop.xlane.xlu0 %1115  ;;  %v712_v42 = vpop.xlane.xlu1 %711  ;;  %v3364_v60 = vshll.u32 %v1650_v28, 16  ;;  %v1272_v9 = vcvt.f32.s32 %v3145_v55 }
 0x3a9   : > { %v1728_v43 = vadd.f32 %v1712_v17, %v1373_v59  ;;  %v744_v29 = vadd.s32 %v3213_v23, %v741_v35  ;;  %v1117_v12 = vcvt.f32.s32 %v1116_v5  ;;  %v1297_v63 = vsel %vm1281_vm7, 1.0, %v2203_v37 }
 0x3aa   : > { %v1777_v10 = vsel %vm1743_vm10, %v1761_v62, 0.0  ;;  %v713_v22 = vcvt.f32.s32 %v712_v42  ;;  %v1362_v38 = vsel %vm1323_vm9, %v1346_v26, 0.0  ;;  %v1766_v23 = vcvt.s32.f32 %v2007_v24 }
 0x3ab   : > { %v1793_v0 = vadd.f32 %v1777_v10, %v1728_v43  ;;  %vm877_vm11 = vcmp.eq.s32.totalorder %v3713_v30, %v744_v29  ;;  %v926_v51 = vcvt.s32.f32 %v744_v29  ;;  %v1120_v25 = vadd.s32 %v3217_v50, %v1117_v12 }
 0x3ac   : > { %v893_v14 = vsel %vm877_vm11, 1.0, %v2203_v37  ;;  %v716_v6 = vadd.s32 %v3215_v36, %v713_v22  ;;  %v1536_v13 = vpop.xlane.xlu0 %1535  ;;  %v754_v18 = vpop.xlane.xlu1 %753  ;;  %vm1701_vm12 = vcmp.eq.s32.totalorder %v3713_v30, %v1568_v7 }
 0x3ad   : > { %v2054_v28 = vpack.c.bf16 %v1793_v0, %v3303_v61  ;;  %v942_v58 = vsel %vm919_vm8, %v926_v51, 0.0  ;;  %v1989_v17 = vadd.s32 4294967287, %v1120_v25  ;;  %vm1279_vm13 = vcmp.eq.s32.totalorder %v3713_v30, %v1120_v25 }
 0x3ae   : > { %v958_v11 = vadd.f32 %v942_v58, %v893_v14  ;;  %vm875_vm14 = vcmp.eq.s32.totalorder %v3713_v30, %v716_v6  ;;  %v924_v50 = vcvt.s32.f32 %v716_v6  ;;  %v1537_v35 = vcvt.f32.s32 %v1536_v13 }
 0x3af   : > { %2055 = vst [vmem:[%s3337_s10] sm:$0xff] %v2054_v28   ;;  %v1344_v59 = vcvt.s32.f32 %v1989_v17  ;;  %v891_v36 = vsel %vm875_vm14, 1.0, %v2203_v37  ;;  %v755_v26 = vcvt.f32.s32 %v754_v18  ;;  %v1717_v7 = vsel %vm1701_vm12, 1.0, %v2203_v37 }
 0x3b0   : > { %v1782_v61 = vsel %vm1743_vm10, %v1766_v23, 0.0  ;;  %v1313_v24 = vadd.f32 %v1297_v63, %v958_v11  ;;  %v940_v62 = vsel %vm919_vm8, %v924_v50, 0.0  ;;  %v796_v5 = vpop.xlane.xlu0 %795  ;;  %v1158_v42 = vpop.xlane.xlu1 %1157  ;;  %v1295_v43 = vsel %vm1279_vm13, 1.0, %v2203_v37 }
 0x3b1   : > { %v956_v29 = vadd.f32 %v940_v62, %v891_v36  ;;  %v1540_v12 = vadd.s32 %v3222_v46, %v1537_v35  ;;  %v758_v10 = vadd.s32 %v3220_v57, %v755_v26  ;;  %v1360_v0 = vsel %vm1323_vm9, %v1344_v59, 0.0 }
 0x3b2   : > { %v1378_v22 = vadd.f32 %v1362_v38, %v1313_v24  ;;  %v797_v51 = vcvt.f32.s32 %v796_v5  ;;  %v1159_v25 = vcvt.f32.s32 %v1158_v42 }
 0x3b3   : > { %v1311_v23 = vadd.f32 %v1295_v43, %v956_v29  ;;  %vm1699_vm15 = vcmp.eq.s32.totalorder %v3713_v30, %v1540_v12  ;;  %v2005_v63 = vadd.s32 4294967262, %v1540_v12  ;;  %vm878_vm0 = vcmp.eq.s32.totalorder %v3713_v30, %v758_v10 }
 0x3b4   : > { %v1733_v14 = vadd.f32 %v1717_v7, %v1378_v22  ;;  %v1715_v6 = vsel %vm1699_vm15, 1.0, %v2203_v37  ;;  %v894_v13 = vsel %vm878_vm0, 1.0, %v2203_v37  ;;  %v927_v46 = vcvt.s32.f32 %v758_v10  ;;  %v1200_v18 = vpop.xlane.xlu0 %1199  ;;  %v1578_v57 = vpop.xlane.xlu1 %1577 }
 0x3b5   : > { %v1376_v38 = vadd.f32 %v1360_v0, %v1311_v23  ;;  %v1764_v28 = vcvt.s32.f32 %v2005_v63  ;;  %v800_v58 = vadd.s32 %v3232_v2, %v797_v51  ;;  %v1162_v17 = vadd.s32 %v3224_v31, %v1159_v25 }
 0x3b6   : > { %v943_v11 = vsel %vm919_vm8, %v927_v46, 0.0  ;;  %v1201_v50 = vcvt.f32.s32 %v1200_v18  ;;  %v3403_v59 = vadd.f32 %v1782_v61, %v1733_v14  ;;  %v1579_v36 = vcvt.f32.s32 %v1578_v57 }
 0x3b7   : > { %v1731_v35 = vadd.f32 %v1715_v6, %v1376_v38  ;;  %v1780_v26 = vsel %vm1743_vm10, %v1764_v28, 0.0  ;;  %v959_v7 = vadd.f32 %v943_v11, %v894_v13  ;;  %vm881_vm1 = vcmp.eq.s32.totalorder %v3713_v30, %v800_v58 }
 0x3b8   : > { %v897_v24 = vsel %vm881_vm1, 1.0, %v2203_v37  ;;  %v930_v62 = vcvt.s32.f32 %v800_v58  ;;  %vm1282_vm2 = vcmp.eq.s32.totalorder %v3713_v30, %v1162_v17  ;;  %v1992_v31 = vadd.s32 4294967287, %v1162_v17  ;;  %v1620_v2 = vpop.xlane.xlu0 %1619  ;;  %v726_v5 = vpop.xlane.xlu1 %725 }
 0x3b9   : > { %v3410_v42 = vadd.f32 %v1780_v26, %v1731_v35  ;;  %v1298_v61 = vsel %vm1282_vm2, 1.0, %v2203_v37  ;;  %v1204_v43 = vadd.s32 %v3242_v15, %v1201_v50  ;;  %v1582_v29 = vadd.s32 %v3240_v33, %v1579_v36 }
 0x3ba   : > { %v946_v12 = vsel %vm919_vm8, %v930_v62, 0.0  ;;  %v1314_v10 = vadd.f32 %v1298_v61, %v959_v7  ;;  %v1347_v22 = vcvt.s32.f32 %v1992_v31  ;;  %v1621_v0 = vcvt.f32.s32 %v1620_v2 }
 0x3bb   : > { %v962_v51 = vadd.f32 %v946_v12, %v897_v24  ;;  %vm1285_vm3 = vcmp.eq.s32.totalorder %v3713_v30, %v1204_v43  ;;  %v1995_v25 = vadd.s32 4294967287, %v1204_v43  ;;  %vm1702_vm4 = vcmp.eq.s32.totalorder %v3713_v30, %v1582_v29 }
 0x3bc   : > { %v1363_v23 = vsel %vm1323_vm9, %v1347_v22, 0.0  ;;  %v1301_v63 = vsel %vm1285_vm3, 1.0, %v2203_v37  ;;  %v1718_v15 = vsel %vm1702_vm4, 1.0, %v2203_v37  ;;  %v2008_v33 = vadd.s32 4294967262, %v1582_v29  ;;  %v768_v14 = vpop.xlane.xlu0 %767  ;;  %v1130_v6 = vpop.xlane.xlu1 %1129 }
 0x3bd   : > { %v1379_v13 = vadd.f32 %v1363_v23, %v1314_v10  ;;  %v1317_v46 = vadd.f32 %v1301_v63, %v962_v51  ;;  %v1350_v18 = vcvt.s32.f32 %v1995_v25  ;;  %v1624_v57 = vadd.s32 %v3246_v16, %v1621_v0 }
 0x3be   : > { %v1767_v38 = vcvt.s32.f32 %v2008_v33  ;;  %v727_v28 = vcvt.f32.s32 %v726_v5  ;;  %v769_v58 = vcvt.f32.s32 %v768_v14  ;;  %v1131_v17 = vcvt.f32.s32 %v1130_v6 }
 0x3bf   : > { %v1366_v11 = vsel %vm1323_vm9, %v1350_v18, 0.0  ;;  %v1734_v50 = vadd.f32 %v1718_v15, %v1379_v13  ;;  %vm1705_vm5 = vcmp.eq.s32.totalorder %v3713_v30, %v1624_v57  ;;  %v2011_v36 = vadd.s32 4294967262, %v1624_v57 }
 0x3c0   : > { %v1382_v35 = vadd.f32 %v1366_v11, %v1317_v46  ;;  %v1783_v26 = vsel %vm1743_vm10, %v1767_v38, 0.0  ;;  %v1721_v7 = vsel %vm1705_vm5, 1.0, %v2203_v37  ;;  %v730_v24 = vadd.s32 %v3244_v1, %v727_v28  ;;  %v1172_v16 = vpop.xlane.xlu0 %1171  ;;  %v1550_v62 = vpop.xlane.xlu1 %1549 }
 0x3c1   : > { %v1799_v31 = vadd.f32 %v1783_v26, %v1734_v50  ;;  %v1770_v2 = vcvt.s32.f32 %v2011_v36  ;;  %v772_v5 = vadd.s32 %v3253_v49, %v769_v58  ;;  %v1134_v61 = vadd.s32 %v3251_v52, %v1131_v17 }
 0x3c2   : > { %v1737_v43 = vadd.f32 %v1721_v7, %v1382_v35  ;;  %vm876_vm6 = vcmp.eq.s32.totalorder %v3713_v30, %v730_v24  ;;  %v925_v29 = vcvt.s32.f32 %v730_v24  ;;  %v1173_v12 = vcvt.f32.s32 %v1172_v16 }
 0x3c3   : > { %v2069_v10 = vpack.c.bf16 %v1799_v31, %v3403_v59  ;;  %v1786_v22 = vsel %vm1743_vm10, %v1770_v2, 0.0  ;;  %v892_v1 = vsel %vm876_vm6, 1.0, %v2203_v37  ;;  %vm879_vm7 = vcmp.eq.s32.totalorder %v3713_v30, %v772_v5 }
 0x3c4   : > { %v3439_v0 = vadd.f32 %v1786_v22, %v1737_v43  ;;  %v941_v49 = vsel %vm919_vm8, %v925_v29, 0.0  ;;  %v895_v52 = vsel %vm879_vm7, 1.0, %v2203_v37  ;;  %v928_v51 = vcvt.s32.f32 %v772_v5  ;;  %v1592_v25 = vpop.xlane.xlu0 %1591  ;;  %v810_v23 = vpop.xlane.xlu1 %809 }
 0x3c5   : > { %2093 = vst [vmem:[%s3337_s10 + $0x18] sm:$0xff] %v2069_v10   ;;  %v957_v63 = vadd.f32 %v941_v49, %v892_v1  ;;  %vm1280_vm11 = vcmp.eq.s32.totalorder %v3713_v30, %v1134_v61  ;;  %v1990_v59 = vadd.s32 4294967287, %v1134_v61  ;;  %v1176_v15 = vadd.s32 %v3271_v39, %v1173_v12 }
 0x3c6   : > { %v944_v33 = vsel %vm919_vm8, %v928_v51, 0.0  ;;  %v1296_v14 = vsel %vm1280_vm11, 1.0, %v2203_v37  ;;  %v1551_v6 = vcvt.f32.s32 %v1550_v62  ;;  %v1593_v13 = vcvt.f32.s32 %v1592_v25 }
 0x3c7   : > { %v960_v46 = vadd.f32 %v944_v33, %v895_v52  ;;  %v1312_v18 = vadd.f32 %v1296_v14, %v957_v63  ;;  %v1345_v57 = vcvt.s32.f32 %v1990_v59  ;;  %vm1283_vm12 = vcmp.eq.s32.totalorder %v3713_v30, %v1176_v15 }
 0x3c8   : > { %v1299_v38 = vsel %vm1283_vm12, 1.0, %v2203_v37  ;;  %v1993_v28 = vadd.s32 4294967287, %v1176_v15  ;;  %v1554_v58 = vadd.s32 %v3261_v19, %v1551_v6  ;;  %v1596_v17 = vadd.s32 %v3308_v54, %v1593_v13  ;;  %v852_v39 = vpop.xlane.xlu0 %851  ;;  %v1214_v11 = vpop.xlane.xlu1 %1213 }
 0x3c9   : > { %v1361_v50 = vsel %vm1323_vm9, %v1345_v57, 0.0  ;;  %v1315_v36 = vadd.f32 %v1299_v38, %v960_v46  ;;  %v811_v35 = vcvt.f32.s32 %v810_v23  ;;  %v853_v26 = vcvt.f32.s32 %v852_v39 }
 0x3ca   : > { %v1377_v7 = vadd.f32 %v1361_v50, %v1312_v18  ;;  %v1348_v24 = vcvt.s32.f32 %v1993_v28  ;;  %vm1700_vm13 = vcmp.eq.s32.totalorder %v3713_v30, %v1554_v58  ;;  %v2006_v16 = vadd.s32 4294967262, %v1554_v58 }
 0x3cb   : > { %v1716_v62 = vsel %vm1700_vm13, 1.0, %v2203_v37  ;;  %vm1703_vm14 = vcmp.eq.s32.totalorder %v3713_v30, %v1596_v17  ;;  %v2009_v19 = vadd.s32 4294967262, %v1596_v17  ;;  %v814_v54 = vadd.s32 %v3280_v41, %v811_v35 }
 0x3cc   : > { %v1364_v31 = vsel %vm1323_vm9, %v1348_v24, 0.0  ;;  %v1732_v2 = vadd.f32 %v1716_v62, %v1377_v7  ;;  %v1765_v5 = vcvt.s32.f32 %v2006_v16  ;;  %v1719_v61 = vsel %vm1703_vm14, 1.0, %v2203_v37  ;;  %v1634_v43 = vpop.xlane.xlu1 %1633  ;;  %v1256_v52 = vpop.xlane.xlu0 %1255 }
 0x3cd   : > { %v1380_v29 = vadd.f32 %v1364_v31, %v1315_v36  ;;  %v1768_v12 = vcvt.s32.f32 %v2009_v19  ;;  %vm882_vm15 = vcmp.eq.s32.totalorder %v3713_v30, %v814_v54  ;;  %v931_v10 = vcvt.s32.f32 %v814_v54 }
 0x3ce   : > { %v1781_v22 = vsel %vm1743_vm10, %v1765_v5, 0.0  ;;  %v898_v1 = vsel %vm882_vm15, 1.0, %v2203_v37  ;;  %v856_v41 = vadd.s32 %v3312_v53, %v853_v26  ;;  %v1215_v49 = vcvt.f32.s32 %v1214_v11 }
 0x3cf   : > { %v1797_v51 = vadd.f32 %v1781_v22, %v1732_v2  ;;  %v1735_v25 = vadd.f32 %v1719_v61, %v1380_v29  ;;  %v1784_v23 = vsel %vm1743_vm10, %v1768_v12, 0.0  ;;  %v947_v63 = vsel %vm919_vm8, %v931_v10, 0.0 }
 0x3d0   : > { %v963_v59 = vadd.f32 %v947_v63, %v898_v1  ;;  %vm885_vm0 = vcmp.eq.s32.totalorder %v3713_v30, %v856_v41  ;;  %v934_v15 = vcvt.s32.f32 %v856_v41  ;;  %v1218_v33 = vadd.s32 %v3310_v32, %v1215_v49  ;;  %v782_v14 = vpop.xlane.xlu1 %781 }
 0x3d1   : > { %v2064_v53 = vpack.c.bf16 %v1797_v51, %v3410_v42  ;;  %v3475_v6 = vadd.f32 %v1784_v23, %v1735_v25  ;;  %v901_v13 = vsel %vm885_vm0, 1.0, %v2203_v37  ;;  %v1257_v46 = vcvt.f32.s32 %v1256_v52 }
 0x3d2   : > { %v950_v18 = vsel %vm919_vm8, %v934_v15, 0.0  ;;  %vm1286_vm1 = vcmp.eq.s32.totalorder %v3713_v30, %v1218_v33  ;;  %v1996_v57 = vadd.s32 4294967287, %v1218_v33  ;;  %v1635_v38 = vcvt.f32.s32 %v1634_v43 }
 0x3d3   : > { %2092 = vst [vmem:[%s3337_s10 + $0x10] sm:$0xff] %v2064_v53   ;;  %v966_v28 = vadd.f32 %v950_v18, %v901_v13  ;;  %v1302_v58 = vsel %vm1286_vm1, 1.0, %v2203_v37  ;;  %v1260_v32 = vadd.s32 %v3320_v20, %v1257_v46  ;;  %v783_v17 = vcvt.f32.s32 %v782_v14 }
 0x3d4   : > { %v3486_v42 = vshll.u32 %v1272_v9, 16  ;;  %v1318_v39 = vadd.f32 %v1302_v58, %v963_v59  ;;  %v1351_v11 = vcvt.s32.f32 %v1996_v57  ;;  %v1638_v50 = vadd.s32 %v3317_v45, %v1635_v38  ;;  %v824_v36 = vpop.xlane.xlu0 %823  ;;  %v1186_v35 = vpop.xlane.xlu1 %1185 }
 0x3d5   : > { %vm1289_vm2 = vcmp.eq.s32.totalorder %v3713_v30, %v1260_v32  ;;  %v1999_v26 = vadd.s32 4294967287, %v1260_v32  ;;  %v786_v7 = vadd.s32 %v3322_v4, %v783_v17  ;;  %v825_v24 = vcvt.f32.s32 %v824_v36 }
 0x3d6   : > { %v1367_v20 = vsel %vm1323_vm9, %v1351_v11, 0.0  ;;  %v1305_v16 = vsel %vm1289_vm2, 1.0, %v2203_v37  ;;  %vm1706_vm3 = vcmp.eq.s32.totalorder %v3713_v30, %v1638_v50  ;;  %v2012_v55 = vadd.s32 4294967262, %v1638_v50 }
 0x3d7   : > { %v1383_v9 = vadd.f32 %v1367_v20, %v1318_v39  ;;  %v1321_v62 = vadd.f32 %v1305_v16, %v966_v28  ;;  %v1354_v19 = vcvt.s32.f32 %v1999_v26  ;;  %v1722_v45 = vsel %vm1706_vm3, 1.0, %v2203_v37 }
 0x3d8   : > { %v1771_v54 = vcvt.s32.f32 %v2012_v55  ;;  %vm880_vm4 = vcmp.eq.s32.totalorder %v3713_v30, %v786_v7  ;;  %v929_v31 = vcvt.s32.f32 %v786_v7  ;;  %v828_v4 = vadd.s32 %v3350_v27, %v825_v24  ;;  %v1228_v2 = vpop.xlane.xlu0 %1227  ;;  %v1606_v5 = vpop.xlane.xlu1 %1605 }
 0x3d9   : > { %v1370_v61 = vsel %vm1323_vm9, %v1354_v19, 0.0  ;;  %v1738_v43 = vadd.f32 %v1722_v45, %v1383_v9  ;;  %v896_v29 = vsel %vm880_vm4, 1.0, %v2203_v37  ;;  %v1187_v12 = vcvt.f32.s32 %v1186_v35 }
 0x3da   : > { %v1787_v10 = vsel %vm1743_vm10, %v1771_v54, 0.0  ;;  %v945_v22 = vsel %vm919_vm8, %v929_v31, 0.0  ;;  %vm883_vm5 = vcmp.eq.s32.totalorder %v3713_v30, %v828_v4  ;;  %v932_v1 = vcvt.s32.f32 %v828_v4 }
 0x3db   : > { %v1803_v41 = vadd.f32 %v1787_v10, %v1738_v43  ;;  %v961_v27 = vadd.f32 %v945_v22, %v896_v29  ;;  %v899_v49 = vsel %vm883_vm5, 1.0, %v2203_v37  ;;  %v1190_v52 = vadd.s32 %v3348_v48, %v1187_v12 }
 0x3dc   : > { %v948_v51 = vsel %vm919_vm8, %v932_v1, 0.0  ;;  %v1229_v25 = vcvt.f32.s32 %v1228_v2  ;;  %v1607_v23 = vcvt.f32.s32 %v1606_v5  ;;  %v1648_v63 = vpop.xlane.xlu0 %1647  ;;  %v866_v59 = vpop.xlane.xlu1 %865  ;;  %v1386_v15 = vadd.f32 %v1370_v61, %v1321_v62 }
 0x3dd   : > { %v2079_v33 = vpack.c.bf16 %v1803_v41, %v3439_v0  ;;  %v964_v14 = vadd.f32 %v948_v51, %v899_v49  ;;  %vm1284_vm6 = vcmp.eq.s32.totalorder %v3713_v30, %v1190_v52  ;;  %v1994_v53 = vadd.s32 4294967287, %v1190_v52 }
 0x3de   : > { %v1300_v13 = vsel %vm1284_vm6, 1.0, %v2203_v37  ;;  %v1232_v46 = vadd.s32 %v3359_v40, %v1229_v25  ;;  %v1610_v48 = vadd.s32 %v3354_v47, %v1607_v23  ;;  %v1649_v18 = vcvt.f32.s32 %v1648_v63 }
 0x3df   : > { %v840_v57 = vcvt.f32.s32 %v3153_v56  ;;  %2095 = vst [vmem:[%s3337_s10 + $0x28] sm:$0xff] %v2079_v33   ;;  %v1316_v38 = vadd.f32 %v1300_v13, %v961_v27  ;;  %v1349_v28 = vcvt.s32.f32 %v1994_v53  ;;  %v867_v58 = vcvt.f32.s32 %v866_v59 }
 0x3e0   : > { %vm1287_vm7 = vcmp.eq.s32.totalorder %v3713_v30, %v1232_v46  ;;  %v1997_v0 = vadd.s32 4294967287, %v1232_v46  ;;  %vm1704_vm11 = vcmp.eq.s32.totalorder %v3713_v30, %v1610_v48  ;;  %v2010_v32 = vadd.s32 4294967262, %v1610_v48  ;;  %v1676_v17 = vpop.xlane.xlu0 %1675  ;;  %v1270_v20 = vpop.xlane.xlu1 %1269 }
 0x3e1   : > { %v1365_v39 = vsel %vm1323_vm9, %v1349_v28, 0.0  ;;  %v1303_v40 = vsel %vm1287_vm7, 1.0, %v2203_v37  ;;  %v1720_v47 = vsel %vm1704_vm11, 1.0, %v2203_v37  ;;  %v1652_v56 = vadd.s32 %v3364_v60, %v1649_v18 }
 0x3e2   : > { %v1381_v11 = vadd.f32 %v1365_v39, %v1316_v38  ;;  %v1319_v50 = vadd.f32 %v1303_v40, %v964_v14  ;;  %v1352_v36 = vcvt.s32.f32 %v1997_v0  ;;  %v1769_v35 = vcvt.s32.f32 %v2010_v32 }
 0x3e3   : > { %vm1707_vm12 = vcmp.eq.s32.totalorder %v3713_v30, %v1652_v56  ;;  %v2013_v26 = vadd.s32 4294967262, %v1652_v56  ;;  %v870_v7 = vadd.s32 %v3362_v3, %v867_v58  ;;  %v1677_v24 = vcvt.f32.s32 %v1676_v17 }
 0x3e4   : > { %v1368_v16 = vsel %vm1323_vm9, %v1352_v36, 0.0  ;;  %v1736_v55 = vadd.f32 %v1720_v47, %v1381_v11  ;;  %v1785_v9 = vsel %vm1743_vm10, %v1769_v35, 0.0  ;;  %v1723_v60 = vsel %vm1707_vm12, 1.0, %v2203_v37 }
 0x3e5   : > { %v1384_v62 = vadd.f32 %v1368_v16, %v1319_v50  ;;  %v1772_v19 = vcvt.s32.f32 %v2013_v26  ;;  %vm886_vm13 = vcmp.eq.s32.totalorder %v3713_v30, %v870_v7  ;;  %v935_v45 = vcvt.s32.f32 %v870_v7 }
 0x3e6   : > { %v1801_v54 = vadd.f32 %v1785_v9, %v1736_v55  ;;  %v902_v31 = vsel %vm886_vm13, 1.0, %v2203_v37  ;;  %v1680_v3 = vadd.s32 %v3324_v34, %v1677_v24  ;;  %v1271_v4 = vcvt.f32.s32 %v1270_v20 }
 0x3e7   : > { %v841_v2 = vshll.u32 %v840_v57, 16  ;;  %v1739_v5 = vadd.f32 %v1723_v60, %v1384_v62  ;;  %v1788_v61 = vsel %vm1743_vm10, %v1772_v19, 0.0  ;;  %v951_v43 = vsel %vm919_vm8, %v935_v45, 0.0 }
 0x3e8   : > { %v2074_v29 = vpack.c.bf16 %v1801_v54, %v3475_v6  ;;  %v967_v12 = vadd.f32 %v951_v43, %v902_v31  ;;  %vm1709_vm14 = vcmp.eq.s32.totalorder %v3713_v30, %v1680_v3  ;;  %v2015_v10 = vadd.s32 4294967262, %v1680_v3  ;;  %v838_v22 = vpop.xlane.xlu1 %837 }
 0x3e9   : > { %v1804_v1 = vadd.f32 %v1788_v61, %v1739_v5  ;;  %v1725_v34 = vsel %vm1709_vm14, 1.0, %v2203_v37  ;;  %v1274_v41 = vadd.s32 %v3486_v42, %v1271_v4  ;;  %v839_v27 = vcvt.f32.s32 %v838_v22 }
 0x3ea   : > { %v1244_v49 = vcvt.f32.s32 %v3158_v21  ;;  %2094 = vst [vmem:[%s3337_s10 + $0x20] sm:$0xff] %v2074_v29   ;;  %v1741_v52 = vadd.f32 %v1725_v34, %v1386_v15  ;;  %v1774_v51 = vcvt.s32.f32 %v2015_v10  ;;  %v1664_v23 = vcvt.f32.s32 %v3163_v8 }
 0x3eb   : > { %vm1290_vm15 = vcmp.eq.s32.totalorder %v3713_v30, %v1274_v41  ;;  %v2000_v25 = vadd.s32 4294967287, %v1274_v41  ;;  %v842_v6 = vadd.s32 %v841_v2, %v839_v27  ;;  %v1692_v28 = vcvt.f32.s32 %v3150_v44 }
 0x3ec   : > { %v1790_v63 = vsel %vm1743_vm10, %v1774_v51, 0.0  ;;  %v1306_v59 = vsel %vm1290_vm15, 1.0, %v2203_v37  ;;  %v1242_v33 = vpop.xlane.xlu1 %1241  ;;  %v1245_v21 = vshll.u32 %v1244_v49, 16  ;;  %v1665_v58 = vshll.u32 %v1664_v23, 16 }
 0x3ed   : > { %v1806_v14 = vadd.f32 %v1790_v63, %v1741_v52  ;;  %v1322_v42 = vadd.f32 %v1306_v59, %v967_v12  ;;  %v1355_v53 = vcvt.s32.f32 %v2000_v25  ;;  %vm884_vm0 = vcmp.eq.s32.totalorder %v3713_v30, %v842_v6 }
 0x3ee   : > { %v900_v15 = vsel %vm884_vm0, 1.0, %v2203_v37  ;;  %v933_v13 = vcvt.s32.f32 %v842_v6  ;;  %v1243_v46 = vcvt.f32.s32 %v1242_v33  ;;  %v1693_v50 = vshll.u32 %v1692_v28, 16 }
 0x3ef   : > { %v1371_v48 = vsel %vm1323_vm9, %v1355_v53, 0.0 }
 0x3f0   : > { %v949_v8 = vsel %vm919_vm8, %v933_v13, 0.0  ;;  %v1246_v18 = vadd.s32 %v1245_v21, %v1243_v46  ;;  %v1662_v57 = vpop.xlane.xlu1 %1661  ;;  %v1387_v38 = vadd.f32 %v1371_v48, %v1322_v42 }
 0x3f1   : > { %v965_v0 = vadd.f32 %v949_v8, %v900_v15  ;;  %v1663_v32 = vcvt.f32.s32 %v1662_v57 }
 0x3f2   : > { %vm1288_vm1 = vcmp.eq.s32.totalorder %v3713_v30, %v1246_v18  ;;  %v1998_v17 = vadd.s32 4294967287, %v1246_v18 }
 0x3f3   : > { %v1304_v39 = vsel %vm1288_vm1, 1.0, %v2203_v37  ;;  %v1666_v40 = vadd.s32 %v1665_v58, %v1663_v32 }
 0x3f4   : > { %v1320_v47 = vadd.f32 %v1304_v39, %v965_v0  ;;  %v1353_v56 = vcvt.s32.f32 %v1998_v17  ;;  %v1690_v11 = vpop.xlane.xlu1 %1689 }
 0x3f5   : > { %vm1708_vm8 = vcmp.eq.s32.totalorder %v3713_v30, %v1666_v40  ;;  %v2014_v36 = vadd.s32 4294967262, %v1666_v40  ;;  %v1691_v35 = vcvt.f32.s32 %v1690_v11 }
 0x3f6   : > { %v1369_v44 = vsel %vm1323_vm9, %v1353_v56, 0.0  ;;  %v1724_v26 = vsel %vm1708_vm8, 1.0, %v2203_v37 }
 0x3f7   : > { %v1385_v7 = vadd.f32 %v1369_v44, %v1320_v47  ;;  %v1773_v24 = vcvt.s32.f32 %v2014_v36  ;;  %v1694_v20 = vadd.s32 %v1693_v50, %v1691_v35 }
 0x3f9   : > { %v1740_v16 = vadd.f32 %v1724_v26, %v1385_v7  ;;  %v1789_v55 = vsel %vm1743_vm10, %v1773_v24, 0.0  ;;  %vm1710_vm2 = vcmp.eq.s32.totalorder %v3713_v30, %v1694_v20  ;;  %v2016_v9 = vadd.s32 4294967262, %v1694_v20 }
 0x3fa   : > { %v1726_v60 = vsel %vm1710_vm2, 1.0, %v2203_v37 }
 0x3fb   : > { %v1805_v62 = vadd.f32 %v1789_v55, %v1740_v16  ;;  %v1742_v19 = vadd.f32 %v1726_v60, %v1387_v38  ;;  %v1775_v45 = vcvt.s32.f32 %v2016_v9 }
 0x3fd   : > { %v2084_v54 = vpack.c.bf16 %v1805_v62, %v1804_v1  ;;  %v1791_v31 = vsel %vm1743_vm10, %v1775_v45, 0.0 }
 0x3fe   : > { %v1807_v3 = vadd.f32 %v1791_v31, %v1742_v19 }
 0x3ff   : > { %2096 = vst [vmem:[%s3337_s10 + $0x30] sm:$0xff] %v2084_v54  }
 0x400   : > { %v2089_v4 = vpack.c.bf16 %v1807_v3, %v1806_v14 }
 0x402   : > { %2097 = vst [vmem:[%s3337_s10 + $0x38] sm:$0xff] %v2089_v4  }
 0x403 PF: > { %s13_s12 = sadd.s32 1, %s2201_s12  }
 0x404   : > { %p10_p4 = scmp.ge.s32.totalorder %s13_s12, 4  }
 0x406   :  { %12 = sbr.rel (!%p10_p4) target bundleno = 1 (0x1), region = 62 }

</bundles_post_ra>
